<compile_context>
chip_gen: v6e
topology: v6e:2x2x1
jax: 0.10.0
libtpu: 0.0.40
codegen_flags: <defaults>
</compile_context>

<pallas_src>
import jax
import jax.numpy as jnp
from jax.experimental import pallas as pl
from jax.experimental.pallas import tpu as pltpu


# ------------------------------ tiling helpers ------------------------------

def _pick_tile(total, candidates):
    """Largest candidate tile that divides `total`, else the full extent."""
    for c in candidates:
        if total >= c and total % c == 0:
            return c
    return total


def _pick_row_tile(n):
    for c in (128, 64, 32, 16, 8):
        if n % c == 0:
            return c
    return n


# ----------------------------- Pallas kernels -------------------------------

def _conv_mm_kernel(w_ref, p_ref, b_ref, o_ref):
    """out(Cout, tm) = relu(W(Cout,K) @ P(K,tm) + b); M on lanes, f32 accum."""
    acc = jnp.dot(w_ref[...], p_ref[...], preferred_element_type=jnp.float32)
    o_ref[...] = jnp.maximum(acc + b_ref[...], 0.0).astype(o_ref.dtype)


def _max4_kernel(a_ref, b_ref, c_ref, d_ref, o_ref):
    """Elementwise max of the 4 pooling taps (pure VPU, lane-dense)."""
    o_ref[...] = jnp.maximum(jnp.maximum(a_ref[...], b_ref[...]),
                             jnp.maximum(c_ref[...], d_ref[...]))


def _fc_fused_kernel(x_ref, w1_ref, b1_ref, w2_ref, b2_ref, o_ref):
    """relu(x @ W1^T + b1) @ W2pad^T + b2pad, in one kernel (weights in VMEM)."""
    h = jnp.dot(x_ref[...], w1_ref[...], preferred_element_type=jnp.float32)
    h = jnp.maximum(h + b1_ref[...], 0.0)
    o = jnp.dot(h.astype(jnp.bfloat16), w2_ref[...],
                preferred_element_type=jnp.float32)
    o_ref[...] = (o + b2_ref[...]).astype(o_ref.dtype)


# ------------------------------ kernel wrappers ------------------------------

def conv_matmul_bias_relu(wmat, bcol, patches):
    """wmat: (Cout, K) bf16, bcol: (Cout, 1) f32, patches: (K, M) bf16.
    Returns (Cout, M) bf16 with M (spatial) on the lane dim."""
    Cout, K = wmat.shape
    M = patches.shape[1]
    tm = _pick_tile(M, (512, 256, 128))
    return pl.pallas_call(
        _conv_mm_kernel,
        out_shape=jax.ShapeDtypeStruct((Cout, M), jnp.bfloat16),
        grid=(M // tm,),
        in_specs=[
            pl.BlockSpec((Cout, K), lambda i: (0, 0)),   # weights resident
            pl.BlockSpec((K, tm), lambda i: (0, i)),     # streamed patches
            pl.BlockSpec((Cout, 1), lambda i: (0, 0)),   # bias resident
        ],
        out_specs=pl.BlockSpec((Cout, tm), lambda i: (0, i)),
        compiler_params=pltpu.CompilerParams(
            dimension_semantics=("parallel",)),
    )(wmat, patches, bcol)


def maxpool2x2_to_flat(y_cm):
    """MaxPool2d(2,2) on channel-major (C, N, H, W).
    Returns (N, C*Ho*Wo) in torch NCHW-flatten order (ready for fc1)."""
    C, N, H, W = y_cm.shape
    Ho, Wo = H // 2, W // 2
    F = C * Ho * Wo
    # 4 lane-contiguous tap views, already transposed to torch flatten order.
    taps = [
        y_cm[:, :, dh::2, dw::2].transpose(1, 0, 2, 3).reshape(N, F)
        for dh in (0, 1) for dw in (0, 1)
    ]
    tf = _pick_tile(F, (2048, 1024, 512, 256, 128))
    return pl.pallas_call(
        _max4_kernel,
        out_shape=jax.ShapeDtypeStruct((N, F), y_cm.dtype),
        grid=(F // tf,),
        in_specs=[pl.BlockSpec((N, tf), lambda i: (0, i)) for _ in range(4)],
        out_specs=pl.BlockSpec((N, tf), lambda i: (0, i)),
        compiler_params=pltpu.CompilerParams(
            dimension_semantics=("parallel",)),
    )(*taps)


def fc1_fc2_fused(x, w1t, b1r, w2t, b2r):
    """x: (N, F) bf16; w1t: (F, 128) bf16; w2t: (128, 128) bf16 (padded).
    Returns (N, 128) f32 padded logits."""
    N, F = x.shape
    D1 = w1t.shape[1]
    D2 = w2t.shape[1]
    tn = _pick_row_tile(N)
    return pl.pallas_call(
        _fc_fused_kernel,
        out_shape=jax.ShapeDtypeStruct((N, D2), jnp.float32),
        grid=(N // tn,),
        in_specs=[
            pl.BlockSpec((tn, F), lambda i: (i, 0)),
            pl.BlockSpec((F, D1), lambda i: (0, 0)),
            pl.BlockSpec((1, D1), lambda i: (0, 0)),
            pl.BlockSpec((D1, D2), lambda i: (0, 0)),
            pl.BlockSpec((1, D2), lambda i: (0, 0)),
        ],
        out_specs=pl.BlockSpec((tn, D2), lambda i: (i, 0)),
        compiler_params=pltpu.CompilerParams(
            dimension_semantics=("parallel",)),
    )(x, w1t, b1r, w2t, b2r)


# ------------------------------- XLA-side glue -------------------------------

def _im2col_taps_cm(x_cm):
    """Channel-major (C, N, H, W) -> patches^T (C*9, N*H*W), 3x3 / pad=1.
    Row index = c*9 + kh*3 + kw, matching torch's Conv2d weight flatten."""
    C, N, H, W = x_cm.shape
    xp = jnp.pad(x_cm, ((0, 0), (0, 0), (1, 1), (1, 1)))
    taps = jnp.stack(
        [xp[:, :, kh:kh + H, kw:kw + W] for kh in range(3) for kw in range(3)],
        axis=1,
    )                                        # (C, 9, N, H, W)
    return taps.reshape(C * 9, N * H * W)


# ------------------------------- full forward --------------------------------

def cnn_forward(kp, x):
    """kp: prepared (kernel-layout) params; x: (N, 1, H, W) float32."""
    N, _, H, W = x.shape
    x_cm = x.astype(jnp.bfloat16).transpose(1, 0, 2, 3)       # (1, N, H, W)

    p1 = _im2col_taps_cm(x_cm)                                # (9, M)
    y1 = conv_matmul_bias_relu(kp["w1m"], kp["b1c"], p1)      # (32, M)
    y1 = y1.reshape(kp["w1m"].shape[0], N, H, W)

    p2 = _im2col_taps_cm(y1)                                  # (288, M)
    y2 = conv_matmul_bias_relu(kp["w2m"], kp["b2c"], p2)      # (64, M)
    y2 = y2.reshape(kp["w2m"].shape[0], N, H, W)

    xf = maxpool2x2_to_flat(y2)                               # (N, 64*Ho*Wo)
    logits_pad = fc1_fc2_fused(xf, kp["wfc1t"], kp["bfc1r"],
                               kp["wfc2t"], kp["bfc2r"])      # (N, 128)
    return logits_pad[:, :10]                                 # fc2 is Linear(128, 10)


# --------------------------------- parameters --------------------------------

def init_params(key, H, W):
    """Synthetic params in the torch module's native layout/shapes."""
    flat = 64 * (H // 2) * (W // 2)   # lazily-built fc1 input dim in the module
    ks = jax.random.split(key, 8)
    s = 0.05
    return {
        "w1": s * jax.random.normal(ks[0], (32, 1, 3, 3), jnp.float32),
        "b1": s * jax.random.normal(ks[1], (32,), jnp.float32),
        "w2": s * jax.random.normal(ks[2], (64, 32, 3, 3), jnp.float32),
        "b2": s * jax.random.normal(ks[3], (64,), jnp.float32),
        "wfc1": s * jax.random.normal(ks[4], (128, flat), jnp.float32),
        "bfc1": s * jax.random.normal(ks[5], (128,), jnp.float32),
        "wfc2": s * jax.random.normal(ks[6], (10, 128), jnp.float32),
        "bfc2": s * jax.random.normal(ks[7], (10,), jnp.float32),
    }


def prepare_params(params):
    """One-time conversion to the kernel layout: reshape/transpose/pad/cast.
    Done outside the jitted forward so no runtime weight transposes remain."""
    f32, bf16 = jnp.float32, jnp.bfloat16
    w1, b1 = params["w1"], params["b1"]
    w2, b2 = params["w2"], params["b2"]
    wfc1, bfc1 = params["wfc1"], params["bfc1"]
    wfc2, bfc2 = params["wfc2"], params["bfc2"]
    pad_o = 128 - wfc2.shape[0]                               # 10 -> 128 lanes
    return {
        "w1m": w1.reshape(w1.shape[0], -1).astype(bf16),      # (32, 9)
        "b1c": b1.reshape(-1, 1).astype(f32),                 # (32, 1)
        "w2m": w2.reshape(w2.shape[0], -1).astype(bf16),      # (64, 288)
        "b2c": b2.reshape(-1, 1).astype(f32),                 # (64, 1)
        "wfc1t": wfc1.T.astype(bf16),                         # (F, 128)
        "bfc1r": bfc1.reshape(1, -1).astype(f32),             # (1, 128)
        "wfc2t": jnp.pad(wfc2.T, ((0, 0), (0, pad_o))).astype(bf16),   # (128, 128)
        "bfc2r": jnp.pad(bfc2, (0, pad_o)).reshape(1, -1).astype(f32),  # (1, 128)
    }


# ------------------------------------ main ------------------------------------

if __name__ == "__main__":
    key = jax.random.PRNGKey(0)
    kx, kp_key = jax.random.split(key)

    # small MNIST-like input: batch=2, 1 channel, 16x16 spatial
    N, C, H, W = 2, 1, 16, 16
    x = jax.random.normal(kx, (N, C, H, W), jnp.float32)
    params = init_params(kp_key, H, W)
    kparams = prepare_params(params)   # one-time kernel-layout weights

    fwd = jax.jit(cnn_forward)
    out = fwd(kparams, x)
    jax.block_until_ready(out)

    assert out.shape == (N, 10) and out.dtype == jnp.float32
    assert bool(jnp.all(jnp.isfinite(out)))
    print("KERNEL_OK")
</pallas_src>

<mosaic_0001>
module attributes {stable_mosaic.version = 11 : i64} {
  func.func @_conv_mm_kernel(%arg0: i32, %arg1: memref<32x9xbf16, #tpu.memory_space<vmem>>, %arg2: memref<9x512xbf16, #tpu.memory_space<vmem>>, %arg3: memref<32x1xf32, #tpu.memory_space<vmem>>, %arg4: memref<32x512xbf16, #tpu.memory_space<vmem>>) attributes {dimension_semantics = [#tpu.dimension_semantics<parallel>], iteration_bounds = array<i64: 1>, scalar_prefetch = 0 : i64, scratch_operands = 0 : i64, tpu.core_type = #tpu.core_type<tc>, window_params = [{pipeline_mode = #tpu.pipeline_mode<synchronous>, transform_indices = @transform_0, window_bounds = array<i64: 32, 9>}, {transform_indices = @transform_1, window_bounds = array<i64: 9, 512>}, {pipeline_mode = #tpu.pipeline_mode<synchronous>, transform_indices = @transform_2, window_bounds = array<i64: 32, 1>}, {transform_indices = @transform_3, window_bounds = array<i64: 32, 512>}]} {
    %c0 = arith.constant 0 : index
    %c0_0 = arith.constant 0 : index
    %0 = vector.load %arg1[%c0, %c0_0] : memref<32x9xbf16, #tpu.memory_space<vmem>>, vector<32x9xbf16>
    %c0_1 = arith.constant 0 : index
    %c0_2 = arith.constant 0 : index
    %1 = vector.load %arg2[%c0_1, %c0_2] : memref<9x512xbf16, #tpu.memory_space<vmem>>, vector<9x512xbf16>
    %cst = arith.constant dense<0.000000e+00> : vector<32x512xf32>
    %2 = tpu.matmul %0, %1, %cst {dimension_numbers = #tpu.dot_dimension_numbers<[1], [0], [0], [1], [0, 0, 1, 1], [], []>} : vector<32x9xbf16>, vector<9x512xbf16>, vector<32x512xf32> -> vector<32x512xf32>
    %c0_3 = arith.constant 0 : index
    %c0_4 = arith.constant 0 : index
    %3 = vector.load %arg3[%c0_3, %c0_4] : memref<32x1xf32, #tpu.memory_space<vmem>>, vector<32x1xf32>
    %4 = vector.broadcast %3 : vector<32x1xf32> to vector<32x512xf32>
    %5 = arith.addf %2, %4 : vector<32x512xf32>
    %cst_5 = arith.constant 0.000000e+00 : f32
    %6 = vector.broadcast %cst_5 : f32 to vector<32x512xf32>
    %7 = arith.maximumf %5, %6 : vector<32x512xf32>
    %8 = arith.truncf %7 : vector<32x512xf32> to vector<32x512xbf16>
    %c0_6 = arith.constant 0 : index
    %c0_7 = arith.constant 0 : index
    %9 = vector.load %arg4[%c0_6, %c0_7] : memref<32x512xbf16, #tpu.memory_space<vmem>>, vector<32x512xbf16>
    tpu.vector_store %arg4[%c0_6, %c0_7], %8 {strides = array<i32>} : memref<32x512xbf16, #tpu.memory_space<vmem>>, vector<32x512xbf16>,
    return
  }
  func.func @transform_0(%arg0: i32) -> (i32, i32) {
    %c0_i32 = arith.constant 0 : i32
    %c0_i32_0 = arith.constant 0 : i32
    %c0_i32_1 = arith.constant 0 : i32
    return %c0_i32, %c0_i32_0 : i32, i32
  }
  func.func @transform_1(%arg0: i32) -> (i32, i32) {
    %c0_i32 = arith.constant 0 : i32
    %c0_i32_0 = arith.constant 0 : i32
    return %c0_i32, %arg0 : i32, i32
  }
  func.func @transform_2(%arg0: i32) -> (i32, i32) {
    %c0_i32 = arith.constant 0 : i32
    %c0_i32_0 = arith.constant 0 : i32
    %c0_i32_1 = arith.constant 0 : i32
    return %c0_i32, %c0_i32_0 : i32, i32
  }
  func.func @transform_3(%arg0: i32) -> (i32, i32) {
    %c0_i32 = arith.constant 0 : i32
    %c0_i32_0 = arith.constant 0 : i32
    return %c0_i32, %arg0 : i32, i32
  }
}

module attributes {stable_mosaic.version = 11 : i64} {
  func.func @_conv_mm_kernel(%arg0: i32, %arg1: memref<64x288xbf16, #tpu.memory_space<vmem>>, %arg2: memref<288x512xbf16, #tpu.memory_space<vmem>>, %arg3: memref<64x1xf32, #tpu.memory_space<vmem>>, %arg4: memref<64x512xbf16, #tpu.memory_space<vmem>>) attributes {dimension_semantics = [#tpu.dimension_semantics<parallel>], iteration_bounds = array<i64: 1>, scalar_prefetch = 0 : i64, scratch_operands = 0 : i64, tpu.core_type = #tpu.core_type<tc>, window_params = [{pipeline_mode = #tpu.pipeline_mode<synchronous>, transform_indices = @transform_0, window_bounds = array<i64: 64, 288>}, {transform_indices = @transform_1, window_bounds = array<i64: 288, 512>}, {pipeline_mode = #tpu.pipeline_mode<synchronous>, transform_indices = @transform_2, window_bounds = array<i64: 64, 1>}, {transform_indices = @transform_3, window_bounds = array<i64: 64, 512>}]} {
    %c0 = arith.constant 0 : index
    %c0_0 = arith.constant 0 : index
    %0 = vector.load %arg1[%c0, %c0_0] : memref<64x288xbf16, #tpu.memory_space<vmem>>, vector<64x288xbf16>
    %c0_1 = arith.constant 0 : index
    %c0_2 = arith.constant 0 : index
    %1 = vector.load %arg2[%c0_1, %c0_2] : memref<288x512xbf16, #tpu.memory_space<vmem>>, vector<288x512xbf16>
    %cst = arith.constant dense<0.000000e+00> : vector<64x512xf32>
    %2 = tpu.matmul %0, %1, %cst {dimension_numbers = #tpu.dot_dimension_numbers<[1], [0], [0], [1], [0, 0, 1, 1], [], []>} : vector<64x288xbf16>, vector<288x512xbf16>, vector<64x512xf32> -> vector<64x512xf32>
    %c0_3 = arith.constant 0 : index
    %c0_4 = arith.constant 0 : index
    %3 = vector.load %arg3[%c0_3, %c0_4] : memref<64x1xf32, #tpu.memory_space<vmem>>, vector<64x1xf32>
    %4 = vector.broadcast %3 : vector<64x1xf32> to vector<64x512xf32>
    %5 = arith.addf %2, %4 : vector<64x512xf32>
    %cst_5 = arith.constant 0.000000e+00 : f32
    %6 = vector.broadcast %cst_5 : f32 to vector<64x512xf32>
    %7 = arith.maximumf %5, %6 : vector<64x512xf32>
    %8 = arith.truncf %7 : vector<64x512xf32> to vector<64x512xbf16>
    %c0_6 = arith.constant 0 : index
    %c0_7 = arith.constant 0 : index
    %9 = vector.load %arg4[%c0_6, %c0_7] : memref<64x512xbf16, #tpu.memory_space<vmem>>, vector<64x512xbf16>
    tpu.vector_store %arg4[%c0_6, %c0_7], %8 {strides = array<i32>} : memref<64x512xbf16, #tpu.memory_space<vmem>>, vector<64x512xbf16>,
    return
  }
  func.func @transform_0(%arg0: i32) -> (i32, i32) {
    %c0_i32 = arith.constant 0 : i32
    %c0_i32_0 = arith.constant 0 : i32
    %c0_i32_1 = arith.constant 0 : i32
    return %c0_i32, %c0_i32_0 : i32, i32
  }
  func.func @transform_1(%arg0: i32) -> (i32, i32) {
    %c0_i32 = arith.constant 0 : i32
    %c0_i32_0 = arith.constant 0 : i32
    return %c0_i32, %arg0 : i32, i32
  }
  func.func @transform_2(%arg0: i32) -> (i32, i32) {
    %c0_i32 = arith.constant 0 : i32
    %c0_i32_0 = arith.constant 0 : i32
    %c0_i32_1 = arith.constant 0 : i32
    return %c0_i32, %c0_i32_0 : i32, i32
  }
  func.func @transform_3(%arg0: i32) -> (i32, i32) {
    %c0_i32 = arith.constant 0 : i32
    %c0_i32_0 = arith.constant 0 : i32
    return %c0_i32, %arg0 : i32, i32
  }
}

module attributes {stable_mosaic.version = 11 : i64} {
  func.func @_max4_kernel(%arg0: i32, %arg1: memref<2x2048xbf16, #tpu.memory_space<vmem>>, %arg2: memref<2x2048xbf16, #tpu.memory_space<vmem>>, %arg3: memref<2x2048xbf16, #tpu.memory_space<vmem>>, %arg4: memref<2x2048xbf16, #tpu.memory_space<vmem>>, %arg5: memref<2x2048xbf16, #tpu.memory_space<vmem>>) attributes {dimension_semantics = [#tpu.dimension_semantics<parallel>], iteration_bounds = array<i64: 2>, scalar_prefetch = 0 : i64, scratch_operands = 0 : i64, tpu.core_type = #tpu.core_type<tc>, window_params = [{transform_indices = @transform_0, window_bounds = array<i64: 2, 2048>}, {transform_indices = @transform_1, window_bounds = array<i64: 2, 2048>}, {transform_indices = @transform_2, window_bounds = array<i64: 2, 2048>}, {transform_indices = @transform_3, window_bounds = array<i64: 2, 2048>}, {transform_indices = @transform_4, window_bounds = array<i64: 2, 2048>}]} {
    %c0 = arith.constant 0 : index
    %c0_0 = arith.constant 0 : index
    %0 = vector.load %arg1[%c0, %c0_0] : memref<2x2048xbf16, #tpu.memory_space<vmem>>, vector<2x2048xbf16>
    %c0_1 = arith.constant 0 : index
    %c0_2 = arith.constant 0 : index
    %1 = vector.load %arg2[%c0_1, %c0_2] : memref<2x2048xbf16, #tpu.memory_space<vmem>>, vector<2x2048xbf16>
    %2 = arith.maximumf %0, %1 : vector<2x2048xbf16>
    %c0_3 = arith.constant 0 : index
    %c0_4 = arith.constant 0 : index
    %3 = vector.load %arg3[%c0_3, %c0_4] : memref<2x2048xbf16, #tpu.memory_space<vmem>>, vector<2x2048xbf16>
    %c0_5 = arith.constant 0 : index
    %c0_6 = arith.constant 0 : index
    %4 = vector.load %arg4[%c0_5, %c0_6] : memref<2x2048xbf16, #tpu.memory_space<vmem>>, vector<2x2048xbf16>
    %5 = arith.maximumf %3, %4 : vector<2x2048xbf16>
    %6 = arith.maximumf %2, %5 : vector<2x2048xbf16>
    %c0_7 = arith.constant 0 : index
    %c0_8 = arith.constant 0 : index
    %7 = vector.load %arg5[%c0_7, %c0_8] : memref<2x2048xbf16, #tpu.memory_space<vmem>>, vector<2x2048xbf16>
    tpu.vector_store %arg5[%c0_7, %c0_8], %6 {strides = array<i32>} : memref<2x2048xbf16, #tpu.memory_space<vmem>>, vector<2x2048xbf16>,
    return
  }
  func.func @transform_0(%arg0: i32) -> (i32, i32) {
    %c0_i32 = arith.constant 0 : i32
    %c0_i32_0 = arith.constant 0 : i32
    return %c0_i32, %arg0 : i32, i32
  }
  func.func @transform_1(%arg0: i32) -> (i32, i32) {
    %c0_i32 = arith.constant 0 : i32
    %c0_i32_0 = arith.constant 0 : i32
    return %c0_i32, %arg0 : i32, i32
  }
  func.func @transform_2(%arg0: i32) -> (i32, i32) {
    %c0_i32 = arith.constant 0 : i32
    %c0_i32_0 = arith.constant 0 : i32
    return %c0_i32, %arg0 : i32, i32
  }
  func.func @transform_3(%arg0: i32) -> (i32, i32) {
    %c0_i32 = arith.constant 0 : i32
    %c0_i32_0 = arith.constant 0 : i32
    return %c0_i32, %arg0 : i32, i32
  }
  func.func @transform_4(%arg0: i32) -> (i32, i32) {
    %c0_i32 = arith.constant 0 : i32
    %c0_i32_0 = arith.constant 0 : i32
    return %c0_i32, %arg0 : i32, i32
  }
}

module attributes {stable_mosaic.version = 11 : i64} {
  func.func @_fc_fused_kernel(%arg0: i32, %arg1: memref<2x4096xbf16, #tpu.memory_space<vmem>>, %arg2: memref<4096x128xbf16, #tpu.memory_space<vmem>>, %arg3: memref<1x128xf32, #tpu.memory_space<vmem>>, %arg4: memref<128x128xbf16, #tpu.memory_space<vmem>>, %arg5: memref<1x128xf32, #tpu.memory_space<vmem>>, %arg6: memref<2x128xf32, #tpu.memory_space<vmem>>) attributes {dimension_semantics = [#tpu.dimension_semantics<parallel>], iteration_bounds = array<i64: 1>, scalar_prefetch = 0 : i64, scratch_operands = 0 : i64, tpu.core_type = #tpu.core_type<tc>, window_params = [{transform_indices = @transform_0, window_bounds = array<i64: 2, 4096>}, {pipeline_mode = #tpu.pipeline_mode<synchronous>, transform_indices = @transform_1, window_bounds = array<i64: 4096, 128>}, {pipeline_mode = #tpu.pipeline_mode<synchronous>, transform_indices = @transform_2, window_bounds = array<i64: 1, 128>}, {pipeline_mode = #tpu.pipeline_mode<synchronous>, transform_indices = @transform_3, window_bounds = array<i64: 128, 128>}, {pipeline_mode = #tpu.pipeline_mode<synchronous>, transform_indices = @transform_4, window_bounds = array<i64: 1, 128>}, {transform_indices = @transform_5, window_bounds = array<i64: 2, 128>}]} {
    %c0 = arith.constant 0 : index
    %c0_0 = arith.constant 0 : index
    %0 = vector.load %arg1[%c0, %c0_0] : memref<2x4096xbf16, #tpu.memory_space<vmem>>, vector<2x4096xbf16>
    %c0_1 = arith.constant 0 : index
    %c0_2 = arith.constant 0 : index
    %1 = vector.load %arg2[%c0_1, %c0_2] : memref<4096x128xbf16, #tpu.memory_space<vmem>>, vector<4096x128xbf16>
    %cst = arith.constant dense<0.000000e+00> : vector<2x128xf32>
    %2 = tpu.matmul %0, %1, %cst {dimension_numbers = #tpu.dot_dimension_numbers<[1], [0], [0], [1], [0, 0, 1, 1], [], []>} : vector<2x4096xbf16>, vector<4096x128xbf16>, vector<2x128xf32> -> vector<2x128xf32>
    %c0_3 = arith.constant 0 : index
    %c0_4 = arith.constant 0 : index
    %3 = vector.load %arg3[%c0_3, %c0_4] : memref<1x128xf32, #tpu.memory_space<vmem>>, vector<1x128xf32>
    %4 = vector.broadcast %3 : vector<1x128xf32> to vector<2x128xf32>
    %5 = arith.addf %2, %4 : vector<2x128xf32>
    %cst_5 = arith.constant 0.000000e+00 : f32
    %6 = vector.broadcast %cst_5 : f32 to vector<2x128xf32>
    %7 = arith.maximumf %5, %6 : vector<2x128xf32>
    %8 = arith.truncf %7 : vector<2x128xf32> to vector<2x128xbf16>
    %c0_6 = arith.constant 0 : index
    %c0_7 = arith.constant 0 : index
    %9 = vector.load %arg4[%c0_6, %c0_7] : memref<128x128xbf16, #tpu.memory_space<vmem>>, vector<128x128xbf16>
    %cst_8 = arith.constant dense<0.000000e+00> : vector<2x128xf32>
    %10 = tpu.matmul %8, %9, %cst_8 {dimension_numbers = #tpu.dot_dimension_numbers<[1], [0], [0], [1], [0, 0, 1, 1], [], []>} : vector<2x128xbf16>, vector<128x128xbf16>, vector<2x128xf32> -> vector<2x128xf32>
    %c0_9 = arith.constant 0 : index
    %c0_10 = arith.constant 0 : index
    %11 = vector.load %arg5[%c0_9, %c0_10] : memref<1x128xf32, #tpu.memory_space<vmem>>, vector<1x128xf32>
    %12 = vector.broadcast %11 : vector<1x128xf32> to vector<2x128xf32>
    %13 = arith.addf %10, %12 : vector<2x128xf32>
    %c0_11 = arith.constant 0 : index
    %c0_12 = arith.constant 0 : index
    %14 = vector.load %arg6[%c0_11, %c0_12] : memref<2x128xf32, #tpu.memory_space<vmem>>, vector<2x128xf32>
    tpu.vector_store %arg6[%c0_11, %c0_12], %13 {strides = array<i32>} : memref<2x128xf32, #tpu.memory_space<vmem>>, vector<2x128xf32>,
    return
  }
  func.func @transform_0(%arg0: i32) -> (i32, i32) {
    %c0_i32 = arith.constant 0 : i32
    %c0_i32_0 = arith.constant 0 : i32
    return %arg0, %c0_i32 : i32, i32
  }
  func.func @transform_1(%arg0: i32) -> (i32, i32) {
    %c0_i32 = arith.constant 0 : i32
    %c0_i32_0 = arith.constant 0 : i32
    %c0_i32_1 = arith.constant 0 : i32
    return %c0_i32, %c0_i32_0 : i32, i32
  }
  func.func @transform_2(%arg0: i32) -> (i32, i32) {
    %c0_i32 = arith.constant 0 : i32
    %c0_i32_0 = arith.constant 0 : i32
    %c0_i32_1 = arith.constant 0 : i32
    return %c0_i32, %c0_i32_0 : i32, i32
  }
  func.func @transform_3(%arg0: i32) -> (i32, i32) {
    %c0_i32 = arith.constant 0 : i32
    %c0_i32_0 = arith.constant 0 : i32
    %c0_i32_1 = arith.constant 0 : i32
    return %c0_i32, %c0_i32_0 : i32, i32
  }
  func.func @transform_4(%arg0: i32) -> (i32, i32) {
    %c0_i32 = arith.constant 0 : i32
    %c0_i32_0 = arith.constant 0 : i32
    %c0_i32_1 = arith.constant 0 : i32
    return %c0_i32, %c0_i32_0 : i32, i32
  }
  func.func @transform_5(%arg0: i32) -> (i32, i32) {
    %c0_i32 = arith.constant 0 : i32
    %c0_i32_0 = arith.constant 0 : i32
    return %arg0, %c0_i32 : i32, i32
  }
}

</mosaic_0001>

<bundles_post_ra>
// kernel: cnn_forward.4
= control target key start
LH: loop header
LB: loop body
LE: loop exit
PB: predicated region body
PF: predicated region fallthrough
CT: control target
= control target key end

     0   :  { %vm80_vm0 = vcmask 1043456   ;;  %vm81_vm1 = vcmask 1044480   ;;  %v316_v1 = vmov 0   ;;  %v317_v2 = vmov 65535   ;;  %s392_s1 = inlined_call_operand.vmem [shape: bf16[9,512], index: 1, kind: input, shape index: {}]   ;;  %s393_s0 = inlined_call_operand.vmem [shape: bf16[32,9], index: 0, kind: input, shape index: {}]   ;;  %s394_s2 = inlined_call_operand.vmem [shape: f32[32,1], index: 2, kind: input, shape index: {}]   ;;  %s395_s3 = inlined_call_operand.vmem [shape: bf16[32,512], index: 3, kind: output, shape index: {}]  }
   0x1   :  { %v308_v0 = vld [vmem:[%s392_s1 + $0x4] ss:$16 sps:$4 sm:$0x1f]   ;;  %128 = vmatprep.mubr.bf16.mxu0 %v316_v1  ;;  %181 = vmatprep.mubr.bf16.mxu1 %v316_v1  ;;  %v82_v3 = vsel %vm80_vm0, 4294967295, %v317_v2  ;;  %vm73_vm2 = vcmask 72704   ;;  %v24_v15 = vld [vmem:[%s394_s2 + $0x8] sm:$0xff] }
   0x2   :  { %306 = vset.pattern.permute.xlu0 %v316_v1  ;;  %307 = vset.pattern.permute.xlu1 %v316_v1  ;;  %v83_v4 = vsel %vm81_vm1, %v82_v3, 0  ;;  %v310_v5 = vld [vmem:[%s392_s1 + $0xc] ss:$16 sps:$4 sm:$0x1f]   ;;  %v23_v12 = vld [vmem:[%s394_s2] sm:$0xff]  ;;  %v25_v14 = vld [vmem:[%s394_s2 + $0x10] sm:$0xff] }
   0x3   :  { %v88_v6 = vand.u32 %v308_v0, %v83_v4  ;;  %v312_v7 = vld [vmem:[%s392_s1] ss:$16 sps:$4 sm:$0x1f]   ;;  %v313_v8 = vld [vmem:[%s392_s1 + $0x8] ss:$16 sps:$4 sm:$0x1f]   ;;  %v94_v9 = vand.u32 %v310_v5, %v83_v4  ;;  %29 = vperm.xlu0 %306, %v23_v12   ;;  %39 = vperm.xlu1 %307, %v25_v14  }
   0x4   :  { %v85_v10 = vand.u32 %v312_v7, %v83_v4  ;;  %v91_v11 = vand.u32 %v313_v8, %v83_v4  ;;  %v314_v13 = vld [vmem:[%s393_s0] sm:$0xff]   ;;  %v26_v16 = vld [vmem:[%s394_s2 + $0x18] sm:$0xff]  ;;  %v315_v17 = vld [vmem:[%s393_s0 + $0x8] sm:$0xff]  }
   0x5   :  { %110 = vmatprep.subr.bf16.mxu0 %v88_v6  ;;  %163 = vmatprep.subr.bf16.mxu1 %v94_v9 }
   0x6   :  { %111 = vmatpush1.bf16.msra.mxu0 %v85_v10  ;;  %164 = vmatpush1.bf16.msra.mxu1 %v91_v11 }
   0x7   :  { %34 = vperm.xlu0 %306, %v24_v15   ;;  %44 = vperm.xlu1 %307, %v26_v16  }
   0x9   :  { %284 = vmatmul.mubr.msk.bf16.vlgmr.msra.gmra.mxu0 %vm73_vm2, %v314_v13  ;;  %286 = vmatmul.mubr.msk.bf16.vlgmr.msra.gmra.mxu1 %vm73_vm2, %v314_v13 }
   0xa   :  { %138 = vmatprep.mubr.bf16.mxu0 %v316_v1  ;;  %191 = vmatprep.mubr.bf16.mxu1 %v316_v1 }
  0x11   :  { %285 = vmatmul.mubr.msk.bf16.gmra.mxu0 %vm73_vm2, %v315_v17  ;;  %287 = vmatmul.mubr.msk.bf16.gmra.mxu1 %vm73_vm2, %v315_v17 }
  0x7e   :  { %v30_v18 = vpop.permute.xlu0 %29  ;;  %v40_v40 = vpop.permute.xlu1 %39 }
  0x82   :  { %v35_v27 = vpop.permute.xlu0 %34  ;;  %v45_v61 = vpop.permute.xlu1 %44 }
  0xc9   :  { %v130_v19 = vpop.f32.mrf.mxu0  ;;  %v183_v20 = vpop.f32.mrf.mxu1 }
  0xca   :  { %v131_v21 = vadd.f32 %v130_v19, %v30_v18  ;;  %v184_v22 = vadd.f32 %v183_v20, %v30_v18 }
  0xcb   :  { %v132_v23 = vpop.f32.mrf.mxu0  ;;  %v185_v24 = vpop.f32.mrf.mxu1 }
  0xcc   :  { %v133_v25 = vadd.f32 %v132_v23, %v30_v18  ;;  %v186_v26 = vadd.f32 %v185_v24, %v30_v18  ;;  %v202_v30 = vmax.f32 %v131_v21, 0.0  ;;  %v204_v31 = vmax.f32 %v184_v22, 0.0 }
  0xcd   :  { %v134_v28 = vpop.f32.mrf.mxu0  ;;  %v187_v29 = vpop.f32.mrf.mxu1 }
  0xce   :  { %v203_v32 = vmax.f32 %v133_v25, 0.0  ;;  %v205_v33 = vmax.f32 %v186_v26, 0.0  ;;  %v135_v34 = vadd.f32 %v134_v28, %v35_v27  ;;  %v188_v35 = vadd.f32 %v187_v29, %v35_v27 }
  0xcf   :  { %v136_v36 = vpop.f32.mrf.mxu0  ;;  %v189_v37 = vpop.f32.mrf.mxu1 }
  0xd0   :  { %v296_v38 = vpack.c.bf16 %v203_v32, %v202_v30  ;;  %v297_v39 = vpack.c.bf16 %v205_v33, %v204_v31  ;;  %v137_v41 = vadd.f32 %v136_v36, %v35_v27  ;;  %v190_v42 = vadd.f32 %v189_v37, %v35_v27 }
  0xd1   :  { %v140_v43 = vpop.f32.mrf.mxu0  ;;  %v193_v44 = vpop.f32.mrf.mxu1  ;;  %v206_v47 = vmax.f32 %v135_v34, 0.0  ;;  %v208_v48 = vmax.f32 %v188_v35, 0.0 }
  0xd2   :  { %266 = vst [vmem:[%s395_s3] sm:$0xff] %v296_v38  ;;  %267 = vst [vmem:[%s395_s3 + $0x8] sm:$0xff] %v297_v39  ;;  %v141_v45 = vadd.f32 %v140_v43, %v40_v40  ;;  %v194_v46 = vadd.f32 %v193_v44, %v40_v40  ;;  %v207_v49 = vmax.f32 %v137_v41, 0.0  ;;  %v209_v50 = vmax.f32 %v190_v42, 0.0 }
  0xd3   :  { %v142_v51 = vpop.f32.mrf.mxu0  ;;  %v195_v52 = vpop.f32.mrf.mxu1 }
  0xd4   :  { %v143_v53 = vadd.f32 %v142_v51, %v40_v40  ;;  %v196_v54 = vadd.f32 %v195_v52, %v40_v40  ;;  %v298_v55 = vpack.c.bf16 %v207_v49, %v206_v47  ;;  %v299_v56 = vpack.c.bf16 %v209_v50, %v208_v48 }
  0xd5   :  { %v144_v57 = vpop.f32.mrf.mxu0  ;;  %v197_v58 = vpop.f32.mrf.mxu1  ;;  %v210_v59 = vmax.f32 %v141_v45, 0.0  ;;  %v212_v60 = vmax.f32 %v194_v46, 0.0 }
  0xd6   :  { %v211_v62 = vmax.f32 %v143_v53, 0.0  ;;  %v213_v63 = vmax.f32 %v196_v54, 0.0  ;;  %268 = vst [vmem:[%s395_s3 + $0x10] sm:$0xff] %v298_v55  ;;  %269 = vst [vmem:[%s395_s3 + $0x18] sm:$0xff] %v299_v56  ;;  %v145_v0 = vadd.f32 %v144_v57, %v45_v61  ;;  %v198_v1 = vadd.f32 %v197_v58, %v45_v61 }
  0xd7   :  { %v146_v2 = vpop.f32.mrf.mxu0  ;;  %v199_v3 = vpop.f32.mrf.mxu1 }
  0xd8   :  { %v300_v4 = vpack.c.bf16 %v211_v62, %v210_v59  ;;  %v301_v5 = vpack.c.bf16 %v213_v63, %v212_v60  ;;  %v147_v6 = vadd.f32 %v146_v2, %v45_v61  ;;  %v200_v7 = vadd.f32 %v199_v3, %v45_v61 }
  0xd9   :  { %v214_v8 = vmax.f32 %v145_v0, 0.0  ;;  %v216_v9 = vmax.f32 %v198_v1, 0.0 }
  0xda   :  { %270 = vst [vmem:[%s395_s3 + $0x20] sm:$0xff] %v300_v4  ;;  %271 = vst [vmem:[%s395_s3 + $0x28] sm:$0xff] %v301_v5  ;;  %v215_v10 = vmax.f32 %v147_v6, 0.0  ;;  %v217_v11 = vmax.f32 %v200_v7, 0.0 }
  0xdc   :  { %v302_v12 = vpack.c.bf16 %v215_v10, %v214_v8  ;;  %v303_v13 = vpack.c.bf16 %v217_v11, %v216_v9 }
  0xde   :  { %272 = vst [vmem:[%s395_s3 + $0x30] sm:$0xff] %v302_v12  ;;  %273 = vst [vmem:[%s395_s3 + $0x38] sm:$0xff] %v303_v13 }

// kernel: cnn_forward.5
= control target key start
LH: loop header
LB: loop body
LE: loop exit
PB: predicated region body
PF: predicated region fallthrough
CT: control target
= control target key end

     0   :  { %v1279_v1 = vmov 0   ;;  %vm571_vm0 = vcmask 261120   ;;  %s1757_s1 = inlined_call_operand.vmem [shape: bf16[288,512], index: 1, kind: input, shape index: {}]   ;;  %s1758_s0 = inlined_call_operand.vmem [shape: bf16[64,288], index: 0, kind: input, shape index: {}]   ;;  %s1759_s2 = inlined_call_operand.vmem [shape: f32[64,1], index: 2, kind: input, shape index: {}]   ;;  %s1760_s3 = inlined_call_operand.vmem [shape: bf16[64,512], index: 3, kind: output, shape index: {}]  }
   0x1   :  { %v1155_v0 = vld [vmem:[%s1757_s1 + $0xe4] ss:$16 sps:$4 sm:$0xff]   ;;  %689 = vmatprep.mubr.bf16.mxu1 %v1279_v1  ;;  %1153 = vset.pattern.permute.xlu0 %v1279_v1  ;;  %v1159_v3 = vld [vmem:[%s1757_s1 + $0xe0] ss:$16 sps:$4 sm:$0xff]   ;;  %v1169_v10 = vld [vmem:[%s1757_s1 + $0xe8] ss:$16 sps:$4 sm:$0xff]  }
   0x2   :  { %v1157_v2 = vld [vmem:[%s1757_s1 + $0x224] ss:$16 sps:$4 sm:$0xff]   ;;  %1154 = vset.pattern.permute.xlu1 %v1279_v1  ;;  %584 = vmatprep.subr.bf16.mxu0 %v1155_v0  ;;  %v1160_v4 = vld [vmem:[%s1757_s1 + $0x220] ss:$16 sps:$4 sm:$0xff]   ;;  %v1171_v11 = vld [vmem:[%s1757_s1 + $0xec] ss:$16 sps:$4 sm:$0xff]  }
   0x3   :  { %669 = vmatprep.subr.bf16.mxu1 %v1157_v2  ;;  %v1161_v5 = vld [vmem:[%s1757_s1 + $0xc4] ss:$16 sps:$4 sm:$0xff]   ;;  %585 = vmatpush1.bf16.msra.mxu0 %v1159_v3  ;;  %v1165_v7 = vld [vmem:[%s1757_s1 + $0xc0] ss:$16 sps:$4 sm:$0xff]   ;;  %v1176_v15 = vld [vmem:[%s1757_s1 + $0xc8] ss:$16 sps:$4 sm:$0xff]  }
   0x4   :  { %670 = vmatpush1.bf16.msra.mxu1 %v1160_v4  ;;  %v1163_v6 = vld [vmem:[%s1757_s1 + $0x204] ss:$16 sps:$4 sm:$0xff]   ;;  %586 = vmatprep.subr.bf16.mxu0 %v1161_v5  ;;  %v1166_v8 = vld [vmem:[%s1757_s1 + $0x200] ss:$16 sps:$4 sm:$0xff]   ;;  %v1178_v16 = vld [vmem:[%s1757_s1 + $0xcc] ss:$16 sps:$4 sm:$0xff]  }
   0x5   :  { %671 = vmatprep.subr.bf16.mxu1 %v1163_v6  ;;  %v1167_v9 = vld [vmem:[%s1757_s1 + $0xa4] ss:$16 sps:$4 sm:$0xff]   ;;  %v1172_v12 = vld [vmem:[%s1757_s1 + $0xa0] ss:$16 sps:$4 sm:$0xff]   ;;  %v1184_v19 = vld [vmem:[%s1757_s1 + $0xac] ss:$16 sps:$4 sm:$0xff]  }
   0x6   :  { %v1342_v13 = vld [vmem:[%s1758_s0 + $0x8] ss:$12 sps:$4 sm:$0xff]   ;;  %v1179_v17 = vld [vmem:[%s1757_s1 + $0x80] ss:$16 sps:$4 sm:$0xff]   ;;  %v1190_v23 = vld [vmem:[%s1757_s1 + $0x8c] ss:$16 sps:$4 sm:$0xff]  }
   0x7   :  { %587 = vmatpush1.bf16.msra.mxu0 %v1165_v7  ;;  %v1174_v14 = vld [vmem:[%s1757_s1 + $0x84] ss:$16 sps:$4 sm:$0xff]   ;;  %v1182_v20 = vld [vmem:[%s1757_s1 + $0xa8] ss:$16 sps:$4 sm:$0xff]   ;;  %v1185_v21 = vld [vmem:[%s1757_s1 + $0x60] ss:$16 sps:$4 sm:$0xff]  }
   0x8   :  { %672 = vmatpush1.bf16.msra.mxu1 %v1166_v8  ;;  %588 = vmatprep.subr.bf16.mxu0 %v1167_v9  ;;  %v1180_v18 = vld [vmem:[%s1757_s1 + $0x64] ss:$16 sps:$4 sm:$0xff]   ;;  %v1188_v24 = vld [vmem:[%s1757_s1 + $0x88] ss:$16 sps:$4 sm:$0xff]   ;;  %v1191_v25 = vld [vmem:[%s1757_s1 + $0x40] ss:$16 sps:$4 sm:$0xff]  }
   0x9   :  { %730 = vmatprep.subr.bf16.mxu1 %v1171_v11  ;;  %v1186_v22 = vld [vmem:[%s1757_s1 + $0x44] ss:$16 sps:$4 sm:$0xff]   ;;  %v1196_v27 = vld [vmem:[%s1757_s1 + $0x6c] ss:$16 sps:$4 sm:$0xff]   ;;  %v1194_v28 = vld [vmem:[%s1757_s1 + $0x68] ss:$16 sps:$4 sm:$0xff]  }
   0xa   :  { %v1192_v26 = vld [vmem:[%s1757_s1 + $0x24] ss:$16 sps:$4 sm:$0xff]   ;;  %v1197_v29 = vld [vmem:[%s1757_s1 + $0x20] ss:$16 sps:$4 sm:$0xff]   ;;  %v1202_v31 = vld [vmem:[%s1757_s1 + $0x4c] ss:$16 sps:$4 sm:$0xff]  }
   0xb   :  { %1108 = vmatmul.mubr.msk.bf16.vlgmr.msra.gmra.mxu1 %vm571_vm0, %v1342_v13  ;;  %589 = vmatpush1.bf16.msra.mxu0 %v1172_v12  ;;  %v1198_v30 = vld [vmem:[%s1757_s1 + $0x4] ss:$16 sps:$4 sm:$0xff]   ;;  %v1200_v32 = vld [vmem:[%s1757_s1 + $0x48] ss:$16 sps:$4 sm:$0xff]   ;;  %v1203_v33 = vld [vmem:[%s1757_s1] ss:$16 sps:$4 sm:$0xff]  }
   0xc   :  { %731 = vmatpush1.bf16.msra.mxu1 %v1169_v10  ;;  %590 = vmatprep.subr.bf16.mxu0 %v1174_v14  ;;  %v1204_v34 = vld [vmem:[%s1757_s1 + $0x1e4] ss:$16 sps:$4 sm:$0xff]   ;;  %v1208_v35 = vld [vmem:[%s1757_s1 + $0x2c] ss:$16 sps:$4 sm:$0xff]   ;;  %v1206_v36 = vld [vmem:[%s1757_s1 + $0x28] ss:$16 sps:$4 sm:$0xff]  }
   0xd   :  { %732 = vmatprep.subr.bf16.mxu1 %v1178_v16  ;;  %699 = vmatprep.mubr.bf16.mxu1 %v1279_v1  ;;  %v1209_v37 = vld [vmem:[%s1757_s1 + $0x1e0] ss:$16 sps:$4 sm:$0xff]   ;;  %v1210_v38 = vld [vmem:[%s1757_s1 + $0x1c4] ss:$16 sps:$4 sm:$0xff]   ;;  %v1214_v39 = vld [vmem:[%s1757_s1 + $0xc] ss:$16 sps:$4 sm:$0xff]  }
   0xe   :  { %v1428_v40 = vld [vmem:[%s1758_s0 + $0x20] ss:$12 sps:$4 sm:$0xff]   ;;  %v1212_v41 = vld [vmem:[%s1757_s1 + $0x8] ss:$16 sps:$4 sm:$0xff]   ;;  %v1216_v43 = vld [vmem:[%s1757_s1 + $0x1a4] ss:$16 sps:$4 sm:$0xff]  }
   0xf   :  { %591 = vmatpush1.bf16.msra.mxu0 %v1179_v17  ;;  %v1215_v42 = vld [vmem:[%s1757_s1 + $0x1c0] ss:$16 sps:$4 sm:$0xff]   ;;  %v1220_v44 = vld [vmem:[%s1757_s1 + $0x1ec] ss:$16 sps:$4 sm:$0xff]   ;;  %v1218_v45 = vld [vmem:[%s1757_s1 + $0x1e8] ss:$16 sps:$4 sm:$0xff]  }
  0x10   :  { %733 = vmatpush1.bf16.msra.mxu1 %v1176_v15  ;;  %592 = vmatprep.subr.bf16.mxu0 %v1180_v18  ;;  %v1221_v46 = vld [vmem:[%s1757_s1 + $0x1a0] ss:$16 sps:$4 sm:$0xff]   ;;  %v1222_v47 = vld [vmem:[%s1757_s1 + $0x184] ss:$16 sps:$4 sm:$0xff]   ;;  %v1226_v48 = vld [vmem:[%s1757_s1 + $0x1cc] ss:$16 sps:$4 sm:$0xff]  }
  0x11   :  { %734 = vmatprep.subr.bf16.mxu1 %v1184_v19  ;;  %v1460_v49 = vld [vmem:[%s1758_s0 + $0x38] ss:$12 sps:$4 sm:$0xff]   ;;  %v1227_v51 = vld [vmem:[%s1757_s1 + $0x180] ss:$16 sps:$4 sm:$0xff]   ;;  %v1233_v53 = vld [vmem:[%s1757_s1 + $0x1ac] ss:$16 sps:$4 sm:$0xff]  }
  0x12   :  { %v1224_v50 = vld [vmem:[%s1757_s1 + $0x1c8] ss:$16 sps:$4 sm:$0xff]   ;;  %v1228_v52 = vld [vmem:[%s1757_s1 + $0x164] ss:$16 sps:$4 sm:$0xff]   ;;  %v1234_v56 = vld [vmem:[%s1757_s1 + $0x160] ss:$16 sps:$4 sm:$0xff]  }
  0x13   :  { %593 = vmatpush1.bf16.msra.mxu0 %v1185_v21  ;;  %1109 = vmatmul.mubr.msk.bf16.gmra.mxu1 %vm571_vm0, %v1428_v40  ;;  %v1231_v54 = vld [vmem:[%s1757_s1 + $0x1a8] ss:$16 sps:$4 sm:$0xff]   ;;  %v1256_v55 = vld [vmem:[%s1758_s0 + $0x4] ss:$12 sps:$4 sm:$0xff]   ;;  %v1239_v58 = vld [vmem:[%s1757_s1 + $0x18c] ss:$16 sps:$4 sm:$0xff]  }
  0x14   :  { %735 = vmatpush1.bf16.msra.mxu1 %v1182_v20  ;;  %594 = vmatprep.subr.bf16.mxu0 %v1186_v22  ;;  %v1235_v57 = vld [vmem:[%s1757_s1 + $0x144] ss:$16 sps:$4 sm:$0xff]   ;;  %v1495_v59 = vld [vmem:[%s1758_s0 + $0x50] ss:$12 sps:$4 sm:$0xff]   ;;  %v1237_v60 = vld [vmem:[%s1757_s1 + $0x188] ss:$16 sps:$4 sm:$0xff]  }
  0x15   :  { %736 = vmatprep.subr.bf16.mxu1 %v1190_v23  ;;  %709 = vmatprep.mubr.bf16.mxu1 %v1279_v1  ;;  %v1240_v61 = vld [vmem:[%s1757_s1 + $0x140] ss:$16 sps:$4 sm:$0xff]   ;;  %v1241_v62 = vld [vmem:[%s1757_s1 + $0x124] ss:$16 sps:$4 sm:$0xff]   ;;  %v1246_v63 = vld [vmem:[%s1757_s1 + $0x16c] ss:$16 sps:$4 sm:$0xff]  }
  0x16   :  { %616 = vmatprep.mubr.bf16.mxu0 %v1256_v55  ;;  %v1244_v0 = vld [vmem:[%s1757_s1 + $0x168] ss:$16 sps:$4 sm:$0xff]   ;;  %v1247_v2 = vld [vmem:[%s1757_s1 + $0x120] ss:$16 sps:$4 sm:$0xff]   ;;  %v1248_v3 = vld [vmem:[%s1757_s1 + $0x104] ss:$16 sps:$4 sm:$0xff]  }
  0x17   :  { %595 = vmatpush1.bf16.msra.mxu0 %v1191_v25  ;;  %v1252_v4 = vld [vmem:[%s1757_s1 + $0x14c] ss:$16 sps:$4 sm:$0xff]   ;;  %v103_v5 = vld [vmem:[%s1759_s2] sm:$0xff]  ;;  %v105_v6 = vld [vmem:[%s1759_s2 + $0x10] sm:$0xff] }
  0x18   :  { %737 = vmatpush1.bf16.msra.mxu1 %v1188_v24  ;;  %596 = vmatprep.subr.bf16.mxu0 %v1192_v26  ;;  %v104_v7 = vld [vmem:[%s1759_s2 + $0x8] sm:$0xff]  ;;  %v1253_v9 = vld [vmem:[%s1757_s1 + $0x100] ss:$16 sps:$4 sm:$0xff]   ;;  %v106_v10 = vld [vmem:[%s1759_s2 + $0x18] sm:$0xff] }
  0x19   :  { %738 = vmatprep.subr.bf16.mxu1 %v1196_v27  ;;  %113 = vperm.xlu0 %1153, %v103_v5   ;;  %v1250_v8 = vld [vmem:[%s1757_s1 + $0x148] ss:$16 sps:$4 sm:$0xff]   ;;  %v1260_v11 = vld [vmem:[%s1757_s1 + $0x12c] ss:$16 sps:$4 sm:$0xff]   ;;  %v107_v15 = vld [vmem:[%s1759_s2 + $0x20] sm:$0xff] }
  0x1a   :  { %123 = vperm.xlu1 %1154, %v105_v6   ;;  %v1263_v12 = vld [vmem:[%s1757_s1 + $0x22c] ss:$16 sps:$4 sm:$0xff]   ;;  %v1258_v16 = vld [vmem:[%s1757_s1 + $0x128] ss:$16 sps:$4 sm:$0xff]   ;;  %v109_v22 = vld [vmem:[%s1759_s2 + $0x30] sm:$0xff] }
  0x1b   :  { %597 = vmatpush1.bf16.msra.mxu0 %v1197_v29  ;;  %1110 = vmatmul.mubr.msk.bf16.gmra.mxu1 %vm571_vm0, %v1460_v49  ;;  %v1254_v14 = vld [vmem:[%s1758_s0] ss:$12 sps:$4 sm:$0xff]   ;;  %v1261_v17 = vld [vmem:[%s1757_s1 + $0x228] ss:$16 sps:$4 sm:$0xff]  }
  0x1c   :  { %739 = vmatpush1.bf16.msra.mxu1 %v1194_v28  ;;  %598 = vmatprep.subr.bf16.mxu0 %v1198_v30  ;;  %v108_v18 = vld [vmem:[%s1759_s2 + $0x28] sm:$0xff]  ;;  %v110_v25 = vld [vmem:[%s1759_s2 + $0x38] sm:$0xff]  ;;  %v1270_v27 = vld [vmem:[%s1758_s0 + $0x34] ss:$12 sps:$4 sm:$0xff]  }
  0x1d   :  { %740 = vmatprep.subr.bf16.mxu1 %v1202_v31  ;;  %719 = vmatprep.mubr.bf16.mxu1 %v1279_v1  ;;  %v1266_v19 = vld [vmem:[%s1757_s1 + $0x10c] ss:$16 sps:$4 sm:$0xff]   ;;  %v1264_v23 = vld [vmem:[%s1757_s1 + $0x108] ss:$16 sps:$4 sm:$0xff]  }
  0x1e   :  { %118 = vperm.xlu0 %1153, %v104_v7   ;;  %128 = vperm.xlu1 %1154, %v106_v10   ;;  %v1267_v20 = vld [vmem:[%s1758_s0 + $0x1c] ss:$12 sps:$4 sm:$0xff]   ;;  %v1269_v26 = vld [vmem:[%s1758_s0 + $0x18] ss:$12 sps:$4 sm:$0xff]  }
  0x1f   :  { %599 = vmatpush1.bf16.msra.mxu0 %v1203_v33  ;;  %v1275_v21 = vld [vmem:[%s1757_s1 + $0x20c] ss:$16 sps:$4 sm:$0xff]   ;;  %v1273_v24 = vld [vmem:[%s1757_s1 + $0x208] ss:$16 sps:$4 sm:$0xff]  }
  0x20   :  { %741 = vmatpush1.bf16.msra.mxu1 %v1200_v32  ;;  %600 = vmatprep.subr.bf16.mxu0 %v1204_v34  ;;  %v1272_v28 = vld [vmem:[%s1758_s0 + $0x30] ss:$12 sps:$4 sm:$0xff]   ;;  %v1276_v29 = vld [vmem:[%s1758_s0 + $0x4c] ss:$12 sps:$4 sm:$0xff]   ;;  %v1278_v30 = vld [vmem:[%s1758_s0 + $0x48] ss:$12 sps:$4 sm:$0xff]  }
  0x21   :  { %742 = vmatprep.subr.bf16.mxu1 %v1208_v35 }
  0x22   :  { %133 = vperm.xlu0 %1153, %v107_v15   ;;  %138 = vperm.xlu1 %1154, %v108_v18  }
  0x23   :  { %601 = vmatpush2.bf16.msra.mxu0 %v1209_v37  ;;  %1111 = vmatmul.mubr.msk.bf16.gmra.mxu1 %vm571_vm0, %v1495_v59 }
  0x24   :  { %743 = vmatpush1.bf16.msra.mxu1 %v1206_v36  ;;  %602 = vmatprep.subr.bf16.mxu0 %v1210_v38 }
  0x25   :  { %744 = vmatprep.subr.bf16.mxu1 %v1214_v39  ;;  %762 = vmatprep.mubr.bf16.mxu1 %v1256_v55 }
  0x26   :  { %143 = vperm.xlu0 %1153, %v109_v22   ;;  %148 = vperm.xlu1 %1154, %v110_v25  }
  0x27   :  { %603 = vmatpush2.bf16.msra.mxu0 %v1215_v42 }
  0x28   :  { %745 = vmatpush1.bf16.msra.mxu1 %v1212_v41  ;;  %604 = vmatprep.subr.bf16.mxu0 %v1216_v43 }
  0x29   :  { %746 = vmatprep.subr.bf16.mxu1 %v1220_v44 }
  0x2b   :  { %605 = vmatpush2.bf16.msra.mxu0 %v1221_v46 }
  0x2c   :  { %747 = vmatpush2.bf16.msra.mxu1 %v1218_v45  ;;  %606 = vmatprep.subr.bf16.mxu0 %v1222_v47 }
  0x2d   :  { %748 = vmatprep.subr.bf16.mxu1 %v1226_v48 }
  0x2f   :  { %607 = vmatpush2.bf16.msra.mxu0 %v1227_v51 }
  0x30   :  { %749 = vmatpush2.bf16.msra.mxu1 %v1224_v50  ;;  %608 = vmatprep.subr.bf16.mxu0 %v1228_v52 }
  0x31   :  { %750 = vmatprep.subr.bf16.mxu1 %v1233_v53 }
  0x33   :  { %609 = vmatpush2.bf16.msra.mxu0 %v1234_v56 }
  0x34   :  { %751 = vmatpush2.bf16.msra.mxu1 %v1231_v54  ;;  %610 = vmatprep.subr.bf16.mxu0 %v1235_v57 }
  0x35   :  { %752 = vmatprep.subr.bf16.mxu1 %v1239_v58 }
  0x37   :  { %611 = vmatpush2.bf16.msra.mxu0 %v1240_v61 }
  0x38   :  { %753 = vmatpush2.bf16.msra.mxu1 %v1237_v60  ;;  %612 = vmatprep.subr.bf16.mxu0 %v1241_v62 }
  0x39   :  { %754 = vmatprep.subr.bf16.mxu1 %v1246_v63 }
  0x3b   :  { %613 = vmatpush2.bf16.msra.mxu0 %v1247_v2 }
  0x3c   :  { %755 = vmatpush2.bf16.msra.mxu1 %v1244_v0  ;;  %614 = vmatprep.subr.bf16.mxu0 %v1248_v3 }
  0x3d   :  { %756 = vmatprep.subr.bf16.mxu1 %v1252_v4 }
  0x3f   :  { %615 = vmatpush2.bf16.msra.mxu0 %v1253_v9 }
  0x40   :  { %757 = vmatpush2.bf16.msra.mxu1 %v1250_v8  ;;  %815 = vmatprep.subr.bf16.mxu0 %v1263_v12 }
  0x41   :  { %758 = vmatprep.subr.bf16.mxu1 %v1260_v11 }
  0x42   :  { %617 = vmatmul.mubr.bf16.vlgmr.msra.gmra.mxu0 %v1254_v14 }
  0x43   :  { %816 = vmatpush1.bf16.msra.mxu0 %v1261_v17  ;;  %626 = vmatprep.mubr.bf16.mxu0 %v1267_v20 }
  0x44   :  { %759 = vmatpush2.bf16.msra.mxu1 %v1258_v16  ;;  %817 = vmatprep.subr.bf16.mxu0 %v1275_v21 }
  0x45   :  { %760 = vmatprep.subr.bf16.mxu1 %v1266_v19 }
  0x47   :  { %818 = vmatpush1.bf16.msra.mxu0 %v1273_v24 }
  0x48   :  { %761 = vmatpush2.bf16.msra.mxu1 %v1264_v23 }
  0x49   :  { %1148 = vmatprep.subr.bf16.mxu1 %v1263_v12 }
  0x4a   :  { %627 = vmatmul.mubr.bf16.gmra.mxu0 %v1269_v26 }
  0x4b   :  { %763 = vmatmul.mubr.bf16.vlgmr.msra.gmra.mxu1 %v1254_v14  ;;  %636 = vmatprep.mubr.bf16.mxu0 %v1270_v27 }
  0x4c   :  { %772 = vmatprep.mubr.bf16.mxu1 %v1267_v20  ;;  %1150 = vmatpush1.bf16.msra.mxu1 %v1261_v17 }
  0x4d   :  { %1149 = vmatprep.subr.bf16.mxu1 %v1275_v21 }
  0x50   :  { %1151 = vmatpush1.bf16.msra.mxu1 %v1273_v24 }
  0x52   :  { %637 = vmatmul.mubr.bf16.gmra.mxu0 %v1272_v28 }
  0x53   :  { %773 = vmatmul.mubr.bf16.gmra.mxu1 %v1269_v26  ;;  %646 = vmatprep.mubr.bf16.mxu0 %v1276_v29 }
  0x54   :  { %782 = vmatprep.mubr.bf16.mxu1 %v1270_v27 }
  0x5a   :  { %647 = vmatmul.mubr.bf16.gmra.mxu0 %v1278_v30 }
  0x5b   :  { %783 = vmatmul.mubr.bf16.gmra.mxu1 %v1272_v28  ;;  %835 = vmatprep.mubr.bf16.mxu0 %v1279_v1 }
  0x5c   :  { %792 = vmatprep.mubr.bf16.mxu1 %v1276_v29 }
  0x62   :  { %1112 = vmatmul.mubr.msk.bf16.vlgmr.msra.gmra.mxu0 %vm571_vm0, %v1342_v13 }
  0x63   :  { %793 = vmatmul.mubr.bf16.gmra.mxu1 %v1278_v30  ;;  %845 = vmatprep.mubr.bf16.mxu0 %v1279_v1 }
  0x64   :  { %865 = vmatprep.mubr.bf16.mxu1 %v1279_v1 }
  0x6a   :  { %1113 = vmatmul.mubr.msk.bf16.gmra.mxu0 %vm571_vm0, %v1428_v40 }
  0x6b   :  { %1115 = vmatmul.mubr.msk.bf16.vlgmr.msra.gmra.mxu1 %vm571_vm0, %v1495_v59  ;;  %855 = vmatprep.mubr.bf16.mxu0 %v1279_v1 }
  0x72   :  { %1114 = vmatmul.mubr.msk.bf16.gmra.mxu0 %vm571_vm0, %v1460_v49 }
  0x94   :  { %v1618_v1 = vpop.permute.xlu0 %113 }
  0x95   :  { %v1628_v51 = vpop.permute.xlu1 %123 }
  0x99   :  { %v1625_v48 = vpop.permute.xlu0 %118  ;;  %v1637_v3 = vpop.permute.xlu1 %128 }
  0x9d   :  { %v1648_v16 = vpop.permute.xlu0 %133  ;;  %v1659_v28 = vpop.permute.xlu1 %138 }
  0xcb   :  { %v691_v31 = vpop.f32.mrf.mxu1 }
  0xcd   :  { %v693_v32 = vpop.f32.mrf.mxu1 }
  0xcf   :  { %v695_v33 = vpop.f32.mrf.mxu1 }
  0xd1   :  { %v697_v34 = vpop.f32.mrf.mxu1 }
  0xd3   :  { %v701_v13 = vpop.f32.mrf.mxu1 }
  0xd5   :  { %v703_v35 = vpop.f32.mrf.mxu1 }
  0xd7   :  { %v705_v36 = vpop.f32.mrf.mxu1 }
  0xd9   :  { %v707_v37 = vpop.f32.mrf.mxu1 }
  0xdb   :  { %v711_v38 = vpop.f32.mrf.mxu1 }
  0xdd   :  { %v1610_v39 = vpop.f32.mrf.mxu1 }
  0xdf   :  { %v1612_v40 = vpop.f32.mrf.mxu1 }
  0xe1   :  { %v1614_v41 = vpop.f32.mrf.mxu1 }
  0xe3   :  { %v1616_v42 = vpop.f32.mrf.mxu1 }
  0xe5   :  { %v1620_v43 = vpop.f32.mrf.mxu1 }
  0xe7   :  { %v1622_v45 = vpop.f32.mrf.mxu1 }
  0xe9   :  { %v1630_v53 = vpop.f32.mrf.mxu1 }
 0x102   :  { %v618_v44 = vpop.f32.mrf.mxu0 }
 0x103   :  { %v619_v46 = vadd.f32 %v618_v44, %v1618_v1 }
 0x104   :  { %v620_v47 = vpop.f32.mrf.mxu0 }
 0x105   :  { %v692_v49 = vadd.f32 %v691_v31, %v619_v46  ;;  %v621_v50 = vadd.f32 %v620_v47, %v1618_v1  ;;  %v144_v46 = vpop.permute.xlu0 %143 }
 0x106   :  { %v622_v52 = vpop.f32.mrf.mxu0 }
 0x107   :  { %v694_v54 = vadd.f32 %v693_v32, %v621_v50  ;;  %v623_v55 = vadd.f32 %v622_v52, %v1625_v48  ;;  %v876_v57 = vmax.f32 %v692_v49, 0.0 }
 0x108   :  { %v624_v56 = vpop.f32.mrf.mxu0 }
 0x109   :  { %v877_v58 = vmax.f32 %v694_v54, 0.0  ;;  %v696_v59 = vadd.f32 %v695_v33, %v623_v55  ;;  %v625_v60 = vadd.f32 %v624_v56, %v1625_v48 }
 0x10a   :  { %v628_v61 = vpop.f32.mrf.mxu0 }
 0x10b   :  { %v1634_v62 = vpop.f32.mrf.mxu1  ;;  %v1132_v63 = vpack.c.bf16 %v877_v58, %v876_v57  ;;  %v698_v0 = vadd.f32 %v697_v34, %v625_v60  ;;  %v629_v2 = vadd.f32 %v628_v61, %v1628_v51  ;;  %v880_v6 = vmax.f32 %v696_v59, 0.0  ;;  %v1681_v59 = vpop.permute.xlu1 %148 }
 0x10c   :  { %v630_v4 = vpop.f32.mrf.mxu0 }
 0x10d   :  { %v1639_v5 = vpop.f32.mrf.mxu1  ;;  %1004 = vst [vmem:[%s1760_s3] sm:$0xff] %v1132_v63  ;;  %v881_v7 = vmax.f32 %v698_v0, 0.0  ;;  %v702_v8 = vadd.f32 %v701_v13, %v629_v2  ;;  %v631_v9 = vadd.f32 %v630_v4, %v1628_v51 }
 0x10e   :  { %v632_v10 = vpop.f32.mrf.mxu0 }
 0x10f   :  { %v1645_v11 = vpop.f32.mrf.mxu1  ;;  %v1134_v12 = vpack.c.bf16 %v881_v7, %v880_v6  ;;  %v704_v14 = vadd.f32 %v703_v35, %v631_v9  ;;  %v633_v15 = vadd.f32 %v632_v10, %v1637_v3  ;;  %v884_v19 = vmax.f32 %v702_v8, 0.0 }
 0x110   :  { %v634_v17 = vpop.f32.mrf.mxu0 }
 0x111   :  { %v1650_v18 = vpop.f32.mrf.mxu1  ;;  %1006 = vst [vmem:[%s1760_s3 + $0x10] sm:$0xff] %v1134_v12  ;;  %v885_v20 = vmax.f32 %v704_v14, 0.0  ;;  %v706_v21 = vadd.f32 %v705_v36, %v633_v15  ;;  %v635_v22 = vadd.f32 %v634_v17, %v1637_v3  ;;  %v765_v17 = vadd.f32 %v1634_v62, %v1618_v1 }
 0x112   :  { %v638_v23 = vpop.f32.mrf.mxu0 }
 0x113   :  { %v1656_v24 = vpop.f32.mrf.mxu1  ;;  %v1136_v25 = vpack.c.bf16 %v885_v20, %v884_v19  ;;  %v708_v26 = vadd.f32 %v707_v37, %v635_v22  ;;  %v639_v27 = vadd.f32 %v638_v23, %v1648_v16  ;;  %v888_v31 = vmax.f32 %v706_v21, 0.0 }
 0x114   :  { %v640_v29 = vpop.f32.mrf.mxu0  ;;  %v767_v20 = vadd.f32 %v1639_v5, %v1618_v1 }
 0x115   :  { %v1661_v30 = vpop.f32.mrf.mxu1  ;;  %1008 = vst [vmem:[%s1760_s3 + $0x20] sm:$0xff] %v1136_v25  ;;  %v889_v32 = vmax.f32 %v708_v26, 0.0  ;;  %v712_v33 = vadd.f32 %v711_v38, %v639_v27  ;;  %v641_v34 = vadd.f32 %v640_v29, %v1648_v16  ;;  %v769_v27 = vadd.f32 %v1645_v11, %v1625_v48 }
 0x116   :  { %v642_v13 = vpop.f32.mrf.mxu0  ;;  %v775_v11 = vadd.f32 %v1656_v24, %v1628_v51 }
 0x117   :  { %v1667_v35 = vpop.f32.mrf.mxu1  ;;  %v1138_v36 = vpack.c.bf16 %v889_v32, %v888_v31  ;;  %v714_v37 = vadd.f32 %v1610_v39, %v641_v34  ;;  %v643_v44 = vadd.f32 %v642_v13, %v1659_v28  ;;  %v892_v50 = vmax.f32 %v712_v33, 0.0 }
 0x118   :  { %v644_v47 = vpop.f32.mrf.mxu0  ;;  %v771_v31 = vadd.f32 %v1650_v18, %v1625_v48  ;;  %v777_v48 = vadd.f32 %v1661_v30, %v1628_v51 }
 0x119   :  { %v1671_v49 = vpop.f32.mrf.mxu1  ;;  %1010 = vst [vmem:[%s1760_s3 + $0x30] sm:$0xff] %v1138_v36  ;;  %v893_v38 = vmax.f32 %v714_v37, 0.0  ;;  %v716_v52 = vadd.f32 %v1612_v40, %v643_v44  ;;  %v645_v54 = vadd.f32 %v644_v47, %v1659_v28 }
 0x11a   :  { %v648_v55 = vpop.f32.mrf.mxu0 }
 0x11b   :  { %v1678_v56 = vpop.f32.mrf.mxu1  ;;  %v1140_v39 = vpack.c.bf16 %v893_v38, %v892_v50  ;;  %v718_v57 = vadd.f32 %v1614_v41, %v645_v54  ;;  %v649_v58 = vadd.f32 %v648_v55, %v144_v46  ;;  %v896_v63 = vmax.f32 %v716_v52, 0.0 }
 0x11c   :  { %v650_v60 = vpop.f32.mrf.mxu0 }
 0x11d   :  { %v1683_v61 = vpop.f32.mrf.mxu1  ;;  %1012 = vst [vmem:[%s1760_s3 + $0x40] sm:$0xff] %v1140_v39  ;;  %v897_v40 = vmax.f32 %v718_v57, 0.0  ;;  %v722_v0 = vadd.f32 %v1616_v42, %v649_v58  ;;  %v651_v2 = vadd.f32 %v650_v60, %v144_v46  ;;  %v779_v58 = vadd.f32 %v1667_v35, %v1637_v3 }
 0x11e   :  { %v652_v4 = vpop.f32.mrf.mxu0 }
 0x11f   :  { %v1689_v6 = vpop.f32.mrf.mxu1  ;;  %v1142_v7 = vpack.c.bf16 %v897_v40, %v896_v63  ;;  %v724_v41 = vadd.f32 %v1620_v43, %v651_v2  ;;  %v653_v8 = vadd.f32 %v652_v4, %v1681_v59  ;;  %v900_v12 = vmax.f32 %v722_v0, 0.0 }
 0x120   :  { %v654_v9 = vpop.f32.mrf.mxu0  ;;  %v781_v2 = vadd.f32 %v1671_v49, %v1637_v3 }
 0x121   :  { %v1693_v10 = vpop.f32.mrf.mxu1  ;;  %1014 = vst [vmem:[%s1760_s3 + $0x50] sm:$0xff] %v1142_v7  ;;  %v901_v14 = vmax.f32 %v724_v41, 0.0  ;;  %v726_v42 = vadd.f32 %v1622_v45, %v653_v8  ;;  %v655_v15 = vadd.f32 %v654_v9, %v1681_v59 }
 0x122   :  { %v837_v43 = vpop.f32.mrf.mxu0 }
 0x123   :  { %v794_v19 = vpop.f32.mrf.mxu1  ;;  %v1144_v21 = vpack.c.bf16 %v901_v14, %v900_v12  ;;  %v728_v22 = vadd.f32 %v1630_v53, %v655_v15  ;;  %v838_v23 = vadd.f32 %v837_v43, %v765_v17  ;;  %v904_v45 = vmax.f32 %v726_v42, 0.0 }
 0x124   :  { %v839_v26 = vpop.f32.mrf.mxu0  ;;  %v795_v1 = vadd.f32 %v794_v19, %v144_v46  ;;  %v785_v42 = vadd.f32 %v1678_v56, %v1648_v16  ;;  %v787_v43 = vadd.f32 %v1683_v61, %v1648_v16 }
 0x125   :  { %v796_v25 = vpop.f32.mrf.mxu1  ;;  %1016 = vst [vmem:[%s1760_s3 + $0x60] sm:$0xff] %v1144_v21  ;;  %v905_v62 = vmax.f32 %v728_v22, 0.0  ;;  %v840_v29 = vadd.f32 %v839_v26, %v767_v20  ;;  %v878_v33 = vmax.f32 %v838_v23, 0.0 }
 0x126   :  { %v841_v32 = vpop.f32.mrf.mxu0  ;;  %v797_v18 = vadd.f32 %v796_v25, %v144_v46  ;;  %v789_v25 = vadd.f32 %v1689_v6, %v1659_v28 }
 0x127   :  { %v798_v5 = vpop.f32.mrf.mxu1  ;;  %v1146_v53 = vpack.c.bf16 %v905_v62, %v904_v45  ;;  %v879_v34 = vmax.f32 %v840_v29, 0.0  ;;  %v842_v13 = vadd.f32 %v841_v32, %v769_v27  ;;  %v791_v45 = vadd.f32 %v1693_v10, %v1659_v28 }
 0x128   :  { %v843_v37 = vpop.f32.mrf.mxu0  ;;  %v799_v51 = vadd.f32 %v798_v5, %v1681_v59 }
 0x129   :  { %v800_v36 = vpop.f32.mrf.mxu1  ;;  %1018 = vst [vmem:[%s1760_s3 + $0x70] sm:$0xff] %v1146_v53  ;;  %v1133_v44 = vpack.c.bf16 %v879_v34, %v878_v33  ;;  %v844_v47 = vadd.f32 %v843_v37, %v771_v31  ;;  %v882_v52 = vmax.f32 %v842_v13, 0.0 }
 0x12a   :  { %v847_v50 = vpop.f32.mrf.mxu0  ;;  %v801_v35 = vadd.f32 %v800_v36, %v1681_v59 }
 0x12b   :  { %v867_v38 = vpop.f32.mrf.mxu1  ;;  %1005 = vst [vmem:[%s1760_s3 + $0x8] sm:$0xff] %v1133_v44  ;;  %v883_v54 = vmax.f32 %v844_v47, 0.0  ;;  %v848_v55 = vadd.f32 %v847_v50, %v775_v11 }
 0x12c   :  { %v868_v24 = vadd.f32 %v867_v38, %v795_v1  ;;  %v849_v39 = vpop.f32.mrf.mxu0 }
 0x12d   :  { %v869_v57 = vpop.f32.mrf.mxu1  ;;  %v1135_v60 = vpack.c.bf16 %v883_v54, %v882_v52  ;;  %v850_v63 = vadd.f32 %v849_v39, %v777_v48  ;;  %v886_v4 = vmax.f32 %v848_v55, 0.0 }
 0x12e   :  { %v902_v30 = vmax.f32 %v868_v24, 0.0  ;;  %v870_v46 = vadd.f32 %v869_v57, %v797_v18  ;;  %v851_v40 = vpop.f32.mrf.mxu0 }
 0x12f   :  { %v871_v0 = vpop.f32.mrf.mxu1  ;;  %1007 = vst [vmem:[%s1760_s3 + $0x18] sm:$0xff] %v1135_v60  ;;  %v887_v7 = vmax.f32 %v850_v63, 0.0  ;;  %v852_v41 = vadd.f32 %v851_v40, %v779_v58 }
 0x130   :  { %v903_v8 = vmax.f32 %v870_v46, 0.0  ;;  %v872_v9 = vadd.f32 %v871_v0, %v799_v51  ;;  %v853_v12 = vpop.f32.mrf.mxu0 }
 0x131   :  { %v873_v14 = vpop.f32.mrf.mxu1  ;;  %v1137_v15 = vpack.c.bf16 %v887_v7, %v886_v4  ;;  %v854_v17 = vadd.f32 %v853_v12, %v781_v2  ;;  %v890_v59 = vmax.f32 %v852_v41, 0.0 }
 0x132   :  { %v1145_v19 = vpack.c.bf16 %v903_v8, %v902_v30  ;;  %v874_v3 = vadd.f32 %v873_v14, %v801_v35  ;;  %v857_v49 = vpop.f32.mrf.mxu0  ;;  %v906_v56 = vmax.f32 %v872_v9, 0.0 }
 0x133   :  { %1009 = vst [vmem:[%s1760_s3 + $0x28] sm:$0xff] %v1137_v15  ;;  %v891_v20 = vmax.f32 %v854_v17, 0.0  ;;  %v858_v21 = vadd.f32 %v857_v49, %v785_v42 }
 0x134   :  { %1017 = vst [vmem:[%s1760_s3 + $0x68] sm:$0xff] %v1145_v19  ;;  %v907_v22 = vmax.f32 %v874_v3, 0.0  ;;  %v859_v23 = vpop.f32.mrf.mxu0 }
 0x135   :  { %v1139_v26 = vpack.c.bf16 %v891_v20, %v890_v59  ;;  %v860_v27 = vadd.f32 %v859_v23, %v787_v43  ;;  %v894_v62 = vmax.f32 %v858_v21, 0.0 }
 0x136   :  { %v1147_v16 = vpack.c.bf16 %v907_v22, %v906_v56  ;;  %v861_v61 = vpop.f32.mrf.mxu0 }
 0x137   :  { %1011 = vst [vmem:[%s1760_s3 + $0x38] sm:$0xff] %v1139_v26  ;;  %v895_v29 = vmax.f32 %v860_v27, 0.0  ;;  %v862_v31 = vadd.f32 %v861_v61, %v789_v25 }
 0x138   :  { %1019 = vst [vmem:[%s1760_s3 + $0x78] sm:$0xff] %v1147_v16  ;;  %v863_v1 = vpop.f32.mrf.mxu0 }
 0x139   :  { %v1141_v6 = vpack.c.bf16 %v895_v29, %v894_v62  ;;  %v864_v5 = vadd.f32 %v863_v1, %v791_v45  ;;  %v898_v32 = vmax.f32 %v862_v31, 0.0 }
 0x13b   :  { %1013 = vst [vmem:[%s1760_s3 + $0x48] sm:$0xff] %v1141_v6  ;;  %v899_v28 = vmax.f32 %v864_v5, 0.0 }
 0x13d   :  { %v1143_v10 = vpack.c.bf16 %v899_v28, %v898_v32 }
 0x13f   :  { %1015 = vst [vmem:[%s1760_s3 + $0x58] sm:$0xff] %v1143_v10 }

// kernel: cnn_forward.6
= control target key start
LH: loop header
LB: loop body
LE: loop exit
PB: predicated region body
PF: predicated region fallthrough
CT: control target
= control target key end

     0   :  { %s396_s15 = smov 0   ;;  %s422_s0 = inlined_call_operand.vmem [shape: bf16[2,4096], index: 0, kind: input, shape index: {}]   ;;  %s423_s1 = inlined_call_operand.vmem [shape: bf16[2,4096], index: 1, kind: input, shape index: {}]   ;;  %s424_s2 = inlined_call_operand.vmem [shape: bf16[2,4096], index: 2, kind: input, shape index: {}]   ;;  %s425_s3 = inlined_call_operand.vmem [shape: bf16[2,4096], index: 3, kind: input, shape index: {}]   ;;  %s426_s4 = inlined_call_operand.vmem [shape: bf16[2,4096], index: 4, kind: output, shape index: {}]  }
   0x1 LB: > { %s343_s16 = sadd.s32 4294967295, %s369_s15   ;;  %p347_p0 = scmp.ge.s32.totalorder %s369_s15, 1  ;;  %s369_s15 = sphi %s396_s15, %s14_s15  }
   0x2   : > { %p192_p1 = scmp.lt.s32.totalorder %s369_s15, 3 }
   0x4   : > { %p193_p2 = pnand %p347_p0, %p192_p1 }
   0x5   : > { %s348_s17 = sshll.u32 (!%p193_p2), %s343_s16, 4 }
   0x6   : > { %196 = sbr.rel (%p193_p2) target bundleno = 22 (0x16), region = 36  ;;  %p229_p3 = scmp.lt.s32.totalorder (!%p193_p2), %s348_s17, 31 }
   0xb   : > { %s428_s17 = smov (!%p229_p3, %s348_s17), 31 }
   0xc   : > { %s231_s20 = scalar_lea.vmem %s422_s0, %s428_s17  ;;  %s236_s23 = scalar_lea.vmem %s423_s1, %s428_s17 }
   0xd   : > { %s241_s26 = scalar_lea.vmem %s424_s2, %s428_s17  ;;  %s246_s29 = scalar_lea.vmem %s425_s3, %s428_s17  ;;  %v253_v0 = vld [vmem:[%s231_s20] sm:$0xff]  ;;  %v254_v2 = vld [vmem:[%s231_s20 + $0x8] sm:$0xff] }
   0xe   : > { %v255_v1 = vld [vmem:[%s236_s23] sm:$0xff]  ;;  %v256_v6 = vld [vmem:[%s236_s23 + $0x8] sm:$0xff]  ;;  %s251_s6 = scalar_lea.vmem %s426_s4, %s428_s17 }
   0xf   : > { %v257_v3 = vmax.bf16 %v255_v1, %v253_v0  ;;  %v259_v4 = vld [vmem:[%s241_s26] sm:$0xff]  ;;  %v258_v8 = vmax.bf16 %v256_v6, %v254_v2  ;;  %v260_v9 = vld [vmem:[%s241_s26 + $0x8] sm:$0xff] }
  0x10   : > { %v261_v5 = vld [vmem:[%s246_s29] sm:$0xff]  ;;  %v262_v10 = vld [vmem:[%s246_s29 + $0x8] sm:$0xff] }
  0x11   : > { %v263_v7 = vmax.bf16 %v261_v5, %v259_v4  ;;  %v264_v11 = vmax.bf16 %v262_v10, %v260_v9 }
  0x13   : > { %v265_v12 = vmax.bf16 %v263_v7, %v257_v3  ;;  %v266_v13 = vmax.bf16 %v264_v11, %v258_v8 }
  0x15   : > { %267 = vst [vmem:[%s251_s6] sm:$0xff] %v265_v12  ;;  %268 = vst [vmem:[%s251_s6 + $0x8] sm:$0xff] %v266_v13 }
  0x16 PF: > { %s14_s15 = sadd.s32 1, %s369_s15  }
  0x17   : > { %p11_p4 = scmp.ge.s32.totalorder %s14_s15, 4  }
  0x19   :  { %13 = sbr.rel (!%p11_p4) target bundleno = 1 (0x1), region = 75 }

// kernel: cnn_forward.7
= control target key start
LH: loop header
LB: loop body
LE: loop exit
PB: predicated region body
PF: predicated region fallthrough
CT: control target
= control target key end

     0   :  { %v553_v28 = vlaneseq  ;;  %v4022_v36 = vmov 1966171168   ;;  %s4915_s0 = inlined_call_operand.vmem [shape: bf16[2,4096], index: 0, kind: input, shape index: {}]   ;;  %s4916_s1 = inlined_call_operand.vmem [shape: bf16[4096,128], index: 1, kind: input, shape index: {}]   ;;  %s4917_s2 = inlined_call_operand.vmem [shape: f32[1,128], index: 2, kind: input, shape index: {}]   ;;  %s4918_s3 = inlined_call_operand.vmem [shape: bf16[128,128], index: 3, kind: input, shape index: {}]   ;;  %s4919_s4 = inlined_call_operand.vmem [shape: f32[1,128], index: 4, kind: input, shape index: {}]   ;;  %s4920_s5 = inlined_call_operand.hbm [shape: f32[2,128], index: 5, kind: output, shape index: {}]  }
   0x1   :  { %v3732_v0 = vld [vmem:[%s4916_s1 + $0x78] sm:$0xff]   ;;  %v3736_v4 = vld [vmem:[%s4916_s1 + $0x70] sm:$0xff]   ;;  %v3740_v8 = vld [vmem:[%s4916_s1 + $0x68] sm:$0xff]   ;;  %v551_v37 = vunpack.c.l.s4 %v4022_v36 }
   0x2   :  { %v3733_v1 = vld [vmem:[%s4916_s1 + $0xf8] sm:$0xff]   ;;  %3347 = vmatprep.subr.bf16.mxu0 %v3732_v0  ;;  %v3737_v5 = vld [vmem:[%s4916_s1 + $0xf0] sm:$0xff]   ;;  %v3741_v9 = vld [vmem:[%s4916_s1 + $0xe8] sm:$0xff]   ;;  %v554_v33 = vshrl.u32 %v553_v28, 7 }
   0x3   :  { %v3734_v2 = vld [vmem:[%s4916_s1 + $0x38] sm:$0xff]   ;;  %3369 = vmatprep.subr.bf16.mxu1 %v3733_v1  ;;  %v3738_v6 = vld [vmem:[%s4916_s1 + $0x30] sm:$0xff]   ;;  %v3742_v10 = vld [vmem:[%s4916_s1 + $0x28] sm:$0xff]   ;;  %v552_v40 = vunpack.c.0.s8 %v551_v37 }
   0x4   :  { %v3735_v3 = vld [vmem:[%s4916_s1 + $0xb8] sm:$0xff]   ;;  %3348 = vmatpush3.bf16.msra.mxu0 %v3734_v2  ;;  %v3739_v7 = vld [vmem:[%s4916_s1 + $0xb0] sm:$0xff]   ;;  %v3743_v11 = vld [vmem:[%s4916_s1 + $0xa8] sm:$0xff]  }
   0x5   :  { %3370 = vmatpush3.bf16.msra.mxu1 %v3735_v3  ;;  %3349 = vmatprep.subr.bf16.mxu0 %v3736_v4  ;;  %v3744_v12 = vld [vmem:[%s4916_s1 + $0x60] sm:$0xff]   ;;  %v3748_v16 = vld [vmem:[%s4916_s1 + $0x58] sm:$0xff]   ;;  %v3752_v20 = vld [vmem:[%s4916_s1 + $0x50] sm:$0xff]   ;;  %v4161_v41 = vsub.s32 %v552_v40, %v554_v33 }
   0x6   :  { %3371 = vmatprep.subr.bf16.mxu1 %v3737_v5  ;;  %v3745_v13 = vld [vmem:[%s4916_s1 + $0xe0] sm:$0xff]   ;;  %v3749_v17 = vld [vmem:[%s4916_s1 + $0xd8] sm:$0xff]   ;;  %v3753_v21 = vld [vmem:[%s4916_s1 + $0xd0] sm:$0xff]  }
   0x7   :  { %v3746_v14 = vld [vmem:[%s4916_s1 + $0x20] sm:$0xff]   ;;  %v3750_v18 = vld [vmem:[%s4916_s1 + $0x18] sm:$0xff]   ;;  %v3754_v22 = vld [vmem:[%s4916_s1 + $0x10] sm:$0xff]  }
   0x8   :  { %3350 = vmatpush3.bf16.msra.mxu0 %v3738_v6  ;;  %v3747_v15 = vld [vmem:[%s4916_s1 + $0xa0] sm:$0xff]   ;;  %v3751_v19 = vld [vmem:[%s4916_s1 + $0x98] sm:$0xff]   ;;  %v3755_v23 = vld [vmem:[%s4916_s1 + $0x90] sm:$0xff]  }
   0x9   :  { %3372 = vmatpush3.bf16.msra.mxu1 %v3739_v7  ;;  %3351 = vmatprep.subr.bf16.mxu0 %v3740_v8  ;;  %v3756_v24 = vld [vmem:[%s4916_s1 + $0x48] sm:$0xff]   ;;  %v3760_v29 = vld [vmem:[%s4916_s1 + $0x40] sm:$0xff]   ;;  %v3765_v35 = vld [vmem:[%s4916_s1 + $0x178] sm:$0xff]  }
   0xa   :  { %3373 = vmatprep.subr.bf16.mxu1 %v3741_v9  ;;  %v3757_v25 = vld [vmem:[%s4916_s1 + $0xc8] sm:$0xff]   ;;  %v3761_v30 = vld [vmem:[%s4916_s1 + $0xc0] sm:$0xff]   ;;  %v3766_v38 = vld [vmem:[%s4916_s1 + $0x1f8] sm:$0xff]  }
   0xb   :  { %v3758_v26 = vld [vmem:[%s4916_s1 + $0x8] sm:$0xff]   ;;  %v3762_v31 = vld [vmem:[%s4916_s1] sm:$0xff]   ;;  %v3767_v47 = vld [vmem:[%s4916_s1 + $0x138] sm:$0xff]  }
   0xc   :  { %3352 = vmatpush3.bf16.msra.mxu0 %v3742_v10  ;;  %v3759_v27 = vld [vmem:[%s4916_s1 + $0x88] sm:$0xff]   ;;  %v3763_v32 = vld [vmem:[%s4916_s1 + $0x80] sm:$0xff]   ;;  %v3768_v49 = vld [vmem:[%s4916_s1 + $0x1b8] sm:$0xff]  }
   0xd   :  { %3374 = vmatpush3.bf16.msra.mxu1 %v3743_v11  ;;  %3353 = vmatprep.subr.bf16.mxu0 %v3744_v12  ;;  %v22_v34 = vld [vmem:[%s4915_s0] sm:$0xff]  ;;  %v3769_v52 = vld [vmem:[%s4916_s1 + $0x170] sm:$0xff]   ;;  %v3773_v58 = vld [vmem:[%s4916_s1 + $0x168] sm:$0xff]  }
   0xe   :  { %3375 = vmatprep.subr.bf16.mxu1 %v3745_v13  ;;  %v549_v39 = vcombine.high %v22_v34, %v22_v34  ;;  %v556_v42 = vrot.slane %v22_v34, %v4161_v41  ;;  %v3770_v54 = vld [vmem:[%s4916_s1 + $0x1f0] sm:$0xff]   ;;  %v3774_v59 = vld [vmem:[%s4916_s1 + $0x1e8] sm:$0xff]   ;;  %v3777_v62 = vld [vmem:[%s4916_s1 + $0x160] sm:$0xff]  }
   0xf   :  { %v3771_v55 = vld [vmem:[%s4916_s1 + $0x130] sm:$0xff]   ;;  %v3775_v60 = vld [vmem:[%s4916_s1 + $0x128] sm:$0xff]   ;;  %v3778_v63 = vld [vmem:[%s4916_s1 + $0x1e0] sm:$0xff]  }
  0x10   :  { %3354 = vmatpush3.bf16.msra.mxu0 %v3746_v14  ;;  %v4165_v43 = vrot.slane %v549_v39, %v4161_v41  ;;  %v564_v44 = vcombine.high %v556_v42, %v556_v42  ;;  %v572_v45 = vrot.slane %v556_v42, %v4161_v41  ;;  %v3772_v57 = vld [vmem:[%s4916_s1 + $0x1b0] sm:$0xff]   ;;  %v3776_v61 = vld [vmem:[%s4916_s1 + $0x1a8] sm:$0xff]   ;;  %v3779_v0 = vld [vmem:[%s4916_s1 + $0x120] sm:$0xff]  }
  0x11   :  { %3376 = vmatpush3.bf16.msra.mxu1 %v3747_v15  ;;  %3355 = vmatprep.subr.bf16.mxu0 %v3748_v16  ;;  %v3780_v1 = vld [vmem:[%s4916_s1 + $0x1a0] sm:$0xff]   ;;  %v3781_v2 = vld [vmem:[%s4916_s1 + $0x158] sm:$0xff]   ;;  %v3785_v6 = vld [vmem:[%s4916_s1 + $0x150] sm:$0xff]  }
  0x12   :  { %3377 = vmatprep.subr.bf16.mxu1 %v3749_v17  ;;  %v565_v46 = vcombine.high %v4165_v43, %v4165_v43  ;;  %v586_v48 = vrot.slane %v564_v44, %v4161_v41  ;;  %v594_v51 = vcombine.high %v572_v45, %v572_v45  ;;  %v3782_v3 = vld [vmem:[%s4916_s1 + $0x1d8] sm:$0xff]   ;;  %v3786_v7 = vld [vmem:[%s4916_s1 + $0x1d0] sm:$0xff]   ;;  %v3789_v10 = vld [vmem:[%s4916_s1 + $0x148] sm:$0xff]  }
  0x13   :  { %v3783_v4 = vld [vmem:[%s4916_s1 + $0x118] sm:$0xff]   ;;  %v3787_v8 = vld [vmem:[%s4916_s1 + $0x110] sm:$0xff]   ;;  %v3790_v11 = vld [vmem:[%s4916_s1 + $0x1c8] sm:$0xff]  }
  0x14   :  { %3356 = vmatpush3.bf16.msra.mxu0 %v3750_v18  ;;  %v593_v50 = vrot.slane %v565_v46, %v4161_v41  ;;  %2345 = vmatprep.mubr.bf16.mxu0 %v586_v48  ;;  %v596_v53 = vcombine.high %v586_v48, %v586_v48  ;;  %v3784_v5 = vld [vmem:[%s4916_s1 + $0x198] sm:$0xff]   ;;  %v3788_v9 = vld [vmem:[%s4916_s1 + $0x190] sm:$0xff]   ;;  %v3791_v12 = vld [vmem:[%s4916_s1 + $0x108] sm:$0xff]   ;;  %v579_v18 = vrot.slane %v4165_v43, %v4161_v41 }
  0x15   :  { %3378 = vmatpush3.bf16.msra.mxu1 %v3751_v19  ;;  %3357 = vmatprep.subr.bf16.mxu0 %v3752_v20  ;;  %v3792_v13 = vld [vmem:[%s4916_s1 + $0x188] sm:$0xff]   ;;  %v3793_v14 = vld [vmem:[%s4916_s1 + $0x140] sm:$0xff]   ;;  %v3797_v19 = vld [vmem:[%s4916_s1 + $0x278] sm:$0xff]  }
  0x16   :  { %3379 = vmatprep.subr.bf16.mxu1 %v3753_v21  ;;  %v597_v56 = vcombine.high %v593_v50, %v593_v50  ;;  %2385 = vmatprep.mubr.bf16.mxu1 %v596_v53  ;;  %v3794_v15 = vld [vmem:[%s4916_s1 + $0x1c0] sm:$0xff]   ;;  %v3798_v20 = vld [vmem:[%s4916_s1 + $0x2f8] sm:$0xff]   ;;  %v3805_v28 = vld [vmem:[%s4916_s1 + $0x268] sm:$0xff]  }
  0x17   :  { %v3795_v16 = vld [vmem:[%s4916_s1 + $0x100] sm:$0xff]   ;;  %v3799_v21 = vld [vmem:[%s4916_s1 + $0x238] sm:$0xff]   ;;  %v3817_v40 = vld [vmem:[%s4916_s1 + $0x250] sm:$0xff]  }
  0x18   :  { %3358 = vmatpush3.bf16.msra.mxu0 %v3754_v22  ;;  %v3796_v17 = vld [vmem:[%s4916_s1 + $0x180] sm:$0xff]   ;;  %v3800_v22 = vld [vmem:[%s4916_s1 + $0x2b8] sm:$0xff]   ;;  %v3818_v42 = vld [vmem:[%s4916_s1 + $0x2d0] sm:$0xff]  }
  0x19   :  { %3380 = vmatpush3.bf16.msra.mxu1 %v3755_v23  ;;  %3359 = vmatprep.subr.bf16.mxu0 %v3756_v24  ;;  %v595_v23 = vcombine.high %v579_v18, %v579_v18  ;;  %v3801_v24 = vld [vmem:[%s4916_s1 + $0x270] sm:$0xff]   ;;  %v3810_v33 = vld [vmem:[%s4916_s1 + $0x2e0] sm:$0xff]   ;;  %v3813_v36 = vld [vmem:[%s4916_s1 + $0x258] sm:$0xff]  }
  0x1a   :  { %3381 = vmatprep.subr.bf16.mxu1 %v3757_v25  ;;  %v3802_v25 = vld [vmem:[%s4916_s1 + $0x2f0] sm:$0xff]   ;;  %v3811_v34 = vld [vmem:[%s4916_s1 + $0x220] sm:$0xff]   ;;  %v3814_v37 = vld [vmem:[%s4916_s1 + $0x2d8] sm:$0xff]  }
  0x1b   :  { %v3816_v39 = vld [vmem:[%s4916_s1 + $0x298] sm:$0xff]   ;;  %v3819_v43 = vld [vmem:[%s4916_s1 + $0x210] sm:$0xff]   ;;  %v23_v46 = vld [vmem:[%s4915_s0 + $0x8] sm:$0xff] }
  0x1c   :  { %3360 = vmatpush3.bf16.msra.mxu0 %v3758_v26  ;;  %v3803_v26 = vld [vmem:[%s4916_s1 + $0x230] sm:$0xff]   ;;  %v605_v48 = vrot.slane %v23_v46, %v4161_v41 }
  0x1d   :  { %3382 = vmatpush3.bf16.msra.mxu1 %v3759_v27  ;;  %3361 = vmatprep.subr.bf16.mxu0 %v3760_v29  ;;  %v3804_v27 = vld [vmem:[%s4916_s1 + $0x2b0] sm:$0xff]   ;;  %v3806_v29 = vld [vmem:[%s4916_s1 + $0x2e8] sm:$0xff]  }
  0x1e   :  { %3383 = vmatprep.subr.bf16.mxu1 %v3761_v30  ;;  %v3807_v30 = vld [vmem:[%s4916_s1 + $0x228] sm:$0xff]   ;;  %v3820_v44 = vld [vmem:[%s4916_s1 + $0x290] sm:$0xff]  }
  0x20   :  { %3362 = vmatpush3.bf16.msra.mxu0 %v3762_v31  ;;  %v3808_v31 = vld [vmem:[%s4916_s1 + $0x2a8] sm:$0xff]  }
  0x21   :  { %3384 = vmatpush3.bf16.msra.mxu1 %v3763_v32  ;;  %3391 = vmatprep.subr.bf16.mxu0 %v3765_v35  ;;  %v3809_v32 = vld [vmem:[%s4916_s1 + $0x260] sm:$0xff]  }
  0x22   :  { %3413 = vmatprep.subr.bf16.mxu1 %v3766_v38  ;;  %v3812_v35 = vld [vmem:[%s4916_s1 + $0x2a0] sm:$0xff]   ;;  %v3815_v38 = vld [vmem:[%s4916_s1 + $0x218] sm:$0xff]  }
  0x23   :  { %2346 = vmatmul.mubr.bf16.vlgmr.msra.gmra.mxu0 %v572_v45  ;;  %v3821_v45 = vld [vmem:[%s4916_s1 + $0x248] sm:$0xff]  }
  0x24   :  { %3392 = vmatpush3.bf16.msra.mxu0 %v3767_v47  ;;  %2386 = vmatmul.mubr.bf16.vlgmr.msra.gmra.mxu1 %v594_v51  ;;  %v3822_v47 = vld [vmem:[%s4916_s1 + $0x2c8] sm:$0xff]  }
  0x25   :  { %3393 = vmatprep.subr.bf16.mxu0 %v3769_v52  ;;  %3414 = vmatpush3.bf16.msra.mxu1 %v3768_v49  ;;  %v598_v49 = vcombine.high %v23_v46, %v23_v46  ;;  %v3824_v51 = vld [vmem:[%s4916_s1 + $0x288] sm:$0xff]   ;;  %v613_v52 = vcombine.high %v605_v48, %v605_v48 }
  0x26   :  { %2425 = vmatprep.mubr.bf16.mxu0 %v593_v50  ;;  %3415 = vmatprep.subr.bf16.mxu1 %v3770_v54  ;;  %v3823_v50 = vld [vmem:[%s4916_s1 + $0x208] sm:$0xff]   ;;  %v3825_v54 = vld [vmem:[%s4916_s1 + $0x240] sm:$0xff]  }
  0x27   :  { %2465 = vmatprep.mubr.bf16.mxu1 %v597_v56  ;;  %v4353_v53 = vrot.slane %v598_v49, %v4161_v41  ;;  %v635_v56 = vrot.slane %v613_v52, %v4161_v41  ;;  %v3872_v46 = vld [vmem:[%s4916_s1 + $0x428] sm:$0xff]   ;;  %v3875_v49 = vld [vmem:[%s4916_s1 + $0x4e0] sm:$0xff]   ;;  %v3878_v52 = vld [vmem:[%s4916_s1 + $0x458] sm:$0xff]  }
  0x28   :  { %3394 = vmatpush3.bf16.msra.mxu0 %v3771_v55  ;;  %v3826_v55 = vld [vmem:[%s4916_s1 + $0x2c0] sm:$0xff]  }
  0x29   :  { %3395 = vmatprep.subr.bf16.mxu0 %v3773_v58  ;;  %3416 = vmatpush3.bf16.msra.mxu1 %v3772_v57  ;;  %v614_v57 = vcombine.high %v4353_v53, %v4353_v53  ;;  %v3827_v58 = vld [vmem:[%s4916_s1 + $0x200] sm:$0xff]  }
  0x2a   :  { %3417 = vmatprep.subr.bf16.mxu1 %v3774_v59  ;;  %v3828_v59 = vld [vmem:[%s4916_s1 + $0x280] sm:$0xff]  }
  0x2c   :  { %3396 = vmatpush3.bf16.msra.mxu0 %v3775_v60  ;;  %v645_v60 = vcombine.high %v635_v56, %v635_v56 }
  0x2d   :  { %3397 = vmatprep.subr.bf16.mxu0 %v3777_v62  ;;  %3418 = vmatpush3.bf16.msra.mxu1 %v3776_v61  ;;  %v621_v61 = vrot.slane %v605_v48, %v4161_v41  ;;  %v3829_v62 = vld [vmem:[%s4916_s1 + $0x378] sm:$0xff]   ;;  %v3874_v48 = vld [vmem:[%s4916_s1 + $0x460] sm:$0xff]  }
  0x2e   :  { %3419 = vmatprep.subr.bf16.mxu1 %v3778_v63  ;;  %v3830_v63 = vld [vmem:[%s4916_s1 + $0x3f8] sm:$0xff]  }
  0x30   :  { %3398 = vmatpush3.bf16.msra.mxu0 %v3779_v0  ;;  %v642_v0 = vrot.slane %v614_v57, %v4161_v41  ;;  %v3883_v57 = vld [vmem:[%s4916_s1 + $0x4d0] sm:$0xff]  }
  0x31   :  { %3399 = vmatprep.subr.bf16.mxu0 %v3781_v2  ;;  %3420 = vmatpush3.bf16.msra.mxu1 %v3780_v1  ;;  %v3831_v1 = vld [vmem:[%s4916_s1 + $0x338] sm:$0xff]  }
  0x32   :  { %3421 = vmatprep.subr.bf16.mxu1 %v3782_v3  ;;  %v3832_v2 = vld [vmem:[%s4916_s1 + $0x3b8] sm:$0xff]   ;;  %v643_v3 = vcombine.high %v621_v61, %v621_v61 }
  0x34   :  { %3400 = vmatpush3.bf16.msra.mxu0 %v3783_v4  ;;  %v3833_v4 = vld [vmem:[%s4916_s1 + $0x370] sm:$0xff]  }
  0x35   :  { %3401 = vmatprep.subr.bf16.mxu0 %v3785_v6  ;;  %3422 = vmatpush3.bf16.msra.mxu1 %v3784_v5  ;;  %v3834_v5 = vld [vmem:[%s4916_s1 + $0x3f0] sm:$0xff]   ;;  %v646_v6 = vcombine.high %v642_v0, %v642_v0 }
  0x36   :  { %3423 = vmatprep.subr.bf16.mxu1 %v3786_v7  ;;  %v3835_v7 = vld [vmem:[%s4916_s1 + $0x330] sm:$0xff]  }
  0x38   :  { %3402 = vmatpush3.bf16.msra.mxu0 %v3787_v8  ;;  %v3836_v8 = vld [vmem:[%s4916_s1 + $0x3b0] sm:$0xff]  }
  0x39   :  { %3403 = vmatprep.subr.bf16.mxu0 %v3789_v10  ;;  %3424 = vmatpush3.bf16.msra.mxu1 %v3788_v9  ;;  %v3837_v9 = vld [vmem:[%s4916_s1 + $0x368] sm:$0xff]  }
  0x3a   :  { %3425 = vmatprep.subr.bf16.mxu1 %v3790_v11  ;;  %v3838_v10 = vld [vmem:[%s4916_s1 + $0x3e8] sm:$0xff]  }
  0x3b   :  { %v3839_v11 = vld [vmem:[%s4916_s1 + $0x328] sm:$0xff]  }
  0x3c   :  { %3404 = vmatpush3.bf16.msra.mxu0 %v3791_v12  ;;  %v3840_v12 = vld [vmem:[%s4916_s1 + $0x3a8] sm:$0xff]  }
  0x3d   :  { %3405 = vmatprep.subr.bf16.mxu0 %v3793_v14  ;;  %3426 = vmatpush3.bf16.msra.mxu1 %v3792_v13  ;;  %v3841_v13 = vld [vmem:[%s4916_s1 + $0x360] sm:$0xff]  }
  0x3e   :  { %3427 = vmatprep.subr.bf16.mxu1 %v3794_v15  ;;  %v3842_v14 = vld [vmem:[%s4916_s1 + $0x3e0] sm:$0xff]  }
  0x3f   :  { %v3843_v15 = vld [vmem:[%s4916_s1 + $0x320] sm:$0xff]  }
  0x40   :  { %3406 = vmatpush3.bf16.msra.mxu0 %v3795_v16  ;;  %v3844_v16 = vld [vmem:[%s4916_s1 + $0x3a0] sm:$0xff]  }
  0x41   :  { %3435 = vmatprep.subr.bf16.mxu0 %v3797_v19  ;;  %3428 = vmatpush3.bf16.msra.mxu1 %v3796_v17  ;;  %v3845_v17 = vld [vmem:[%s4916_s1 + $0x358] sm:$0xff]  }
  0x42   :  { %3457 = vmatprep.subr.bf16.mxu1 %v3798_v20  ;;  %v3847_v19 = vld [vmem:[%s4916_s1 + $0x318] sm:$0xff]  }
  0x43   :  { %2426 = vmatmul.mubr.bf16.vlgmr.msra.gmra.mxu0 %v579_v18  ;;  %v3846_v18 = vld [vmem:[%s4916_s1 + $0x3d8] sm:$0xff]  }
  0x44   :  { %3436 = vmatpush3.bf16.msra.mxu0 %v3799_v21  ;;  %2466 = vmatmul.mubr.bf16.vlgmr.msra.gmra.mxu1 %v595_v23  ;;  %v3848_v20 = vld [vmem:[%s4916_s1 + $0x398] sm:$0xff]   ;;  %v3849_v21 = vld [vmem:[%s4916_s1 + $0x350] sm:$0xff]  }
  0x45   :  { %3437 = vmatprep.subr.bf16.mxu0 %v3801_v24  ;;  %3458 = vmatpush3.bf16.msra.mxu1 %v3800_v22  ;;  %v3850_v22 = vld [vmem:[%s4916_s1 + $0x3d0] sm:$0xff]  }
  0x46   :  { %3459 = vmatprep.subr.bf16.mxu1 %v3802_v25  ;;  %2505 = vmatprep.mubr.bf16.mxu0 %v635_v56  ;;  %v3851_v23 = vld [vmem:[%s4916_s1 + $0x310] sm:$0xff]   ;;  %v3853_v25 = vld [vmem:[%s4916_s1 + $0x348] sm:$0xff]  }
  0x47   :  { %2545 = vmatprep.mubr.bf16.mxu1 %v645_v60  ;;  %v3852_v24 = vld [vmem:[%s4916_s1 + $0x390] sm:$0xff]   ;;  %v3886_v60 = vld [vmem:[%s4916_s1 + $0x448] sm:$0xff]  }
  0x48   :  { %3438 = vmatpush3.bf16.msra.mxu0 %v3803_v26  ;;  %v3854_v26 = vld [vmem:[%s4916_s1 + $0x3c8] sm:$0xff]   ;;  %v3882_v56 = vld [vmem:[%s4916_s1 + $0x450] sm:$0xff]  }
  0x49   :  { %3439 = vmatprep.subr.bf16.mxu0 %v3805_v28  ;;  %3460 = vmatpush3.bf16.msra.mxu1 %v3804_v27  ;;  %v3855_v27 = vld [vmem:[%s4916_s1 + $0x308] sm:$0xff]  }
  0x4a   :  { %3461 = vmatprep.subr.bf16.mxu1 %v3806_v29  ;;  %v3856_v28 = vld [vmem:[%s4916_s1 + $0x388] sm:$0xff]   ;;  %v3857_v29 = vld [vmem:[%s4916_s1 + $0x340] sm:$0xff]  }
  0x4c   :  { %3440 = vmatpush3.bf16.msra.mxu0 %v3807_v30  ;;  %v3858_v30 = vld [vmem:[%s4916_s1 + $0x3c0] sm:$0xff]  }
  0x4d   :  { %3441 = vmatprep.subr.bf16.mxu0 %v3809_v32  ;;  %3462 = vmatpush3.bf16.msra.mxu1 %v3808_v31  ;;  %v3859_v31 = vld [vmem:[%s4916_s1 + $0x300] sm:$0xff]  }
  0x4e   :  { %3463 = vmatprep.subr.bf16.mxu1 %v3810_v33  ;;  %v3860_v32 = vld [vmem:[%s4916_s1 + $0x380] sm:$0xff]   ;;  %v628_v33 = vrot.slane %v4353_v53, %v4161_v41  ;;  %v3879_v53 = vld [vmem:[%s4916_s1 + $0x4d8] sm:$0xff]  }
  0x50   :  { %3442 = vmatpush3.bf16.msra.mxu0 %v3811_v34  ;;  %v3862_v34 = vld [vmem:[%s4916_s1 + $0x478] sm:$0xff]  }
  0x51   :  { %3443 = vmatprep.subr.bf16.mxu0 %v3813_v36  ;;  %3464 = vmatpush3.bf16.msra.mxu1 %v3812_v35  ;;  %v3863_v35 = vld [vmem:[%s4916_s1 + $0x4f8] sm:$0xff]  }
  0x52   :  { %3465 = vmatprep.subr.bf16.mxu1 %v3814_v37  ;;  %v3864_v36 = vld [vmem:[%s4916_s1 + $0x438] sm:$0xff]  }
  0x53   :  { %v3865_v37 = vld [vmem:[%s4916_s1 + $0x4b8] sm:$0xff]  }
  0x54   :  { %3444 = vmatpush3.bf16.msra.mxu0 %v3815_v38  ;;  %v644_v38 = vcombine.high %v628_v33, %v628_v33 }
  0x55   :  { %3445 = vmatprep.subr.bf16.mxu0 %v3817_v40  ;;  %3466 = vmatpush3.bf16.msra.mxu1 %v3816_v39  ;;  %v3866_v39 = vld [vmem:[%s4916_s1 + $0x470] sm:$0xff]  }
  0x56   :  { %3467 = vmatprep.subr.bf16.mxu1 %v3818_v42  ;;  %v3867_v40 = vld [vmem:[%s4916_s1 + $0x4f0] sm:$0xff]  }
  0x57   :  { %v3868_v42 = vld [vmem:[%s4916_s1 + $0x430] sm:$0xff]  }
  0x58   :  { %3446 = vmatpush3.bf16.msra.mxu0 %v3819_v43  ;;  %v3869_v43 = vld [vmem:[%s4916_s1 + $0x4b0] sm:$0xff]  }
  0x59   :  { %3447 = vmatprep.subr.bf16.mxu0 %v3821_v45  ;;  %3468 = vmatpush3.bf16.msra.mxu1 %v3820_v44  ;;  %v3870_v44 = vld [vmem:[%s4916_s1 + $0x468] sm:$0xff]  }
  0x5a   :  { %3469 = vmatprep.subr.bf16.mxu1 %v3822_v47  ;;  %v3871_v45 = vld [vmem:[%s4916_s1 + $0x4e8] sm:$0xff]  }
  0x5b   :  { %v3873_v47 = vld [vmem:[%s4916_s1 + $0x4a8] sm:$0xff]  }
  0x5c   :  { %3448 = vmatpush3.bf16.msra.mxu0 %v3823_v50  ;;  %v3876_v50 = vld [vmem:[%s4916_s1 + $0x420] sm:$0xff]  }
  0x5d   :  { %3449 = vmatprep.subr.bf16.mxu0 %v3825_v54  ;;  %3470 = vmatpush3.bf16.msra.mxu1 %v3824_v51  ;;  %v3877_v51 = vld [vmem:[%s4916_s1 + $0x4a0] sm:$0xff]   ;;  %v3880_v54 = vld [vmem:[%s4916_s1 + $0x418] sm:$0xff]  }
  0x5e   :  { %3471 = vmatprep.subr.bf16.mxu1 %v3826_v55  ;;  %v3881_v55 = vld [vmem:[%s4916_s1 + $0x498] sm:$0xff]  }
  0x60   :  { %3450 = vmatpush3.bf16.msra.mxu0 %v3827_v58  ;;  %v3884_v58 = vld [vmem:[%s4916_s1 + $0x410] sm:$0xff]  }
  0x61   :  { %3479 = vmatprep.subr.bf16.mxu0 %v3829_v62  ;;  %3472 = vmatpush3.bf16.msra.mxu1 %v3828_v59  ;;  %v3885_v59 = vld [vmem:[%s4916_s1 + $0x490] sm:$0xff]   ;;  %v3887_v62 = vld [vmem:[%s4916_s1 + $0x4c8] sm:$0xff]  }
  0x62   :  { %3501 = vmatprep.subr.bf16.mxu1 %v3830_v63 }
  0x63   :  { %2506 = vmatmul.mubr.bf16.vlgmr.msra.gmra.mxu0 %v621_v61  ;;  %v24_v61 = vld [vmem:[%s4915_s0 + $0x10] sm:$0xff] }
  0x64   :  { %3480 = vmatpush3.bf16.msra.mxu0 %v3831_v1  ;;  %2585 = vmatprep.mubr.bf16.mxu0 %v642_v0  ;;  %v654_v63 = vrot.slane %v24_v61, %v4161_v41  ;;  %v647_v0 = vcombine.high %v24_v61, %v24_v61  ;;  %v3888_v1 = vld [vmem:[%s4916_s1 + $0x408] sm:$0xff]  }
  0x65   :  { %2546 = vmatmul.mubr.bf16.vlgmr.msra.gmra.mxu1 %v643_v3  ;;  %3481 = vmatprep.subr.bf16.mxu0 %v3833_v4  ;;  %v3937_v61 = vld [vmem:[%s4916_s1 + $0x628] sm:$0xff]  }
  0x66   :  { %3502 = vmatpush3.bf16.msra.mxu1 %v3832_v2  ;;  %2625 = vmatprep.mubr.bf16.mxu1 %v646_v6  ;;  %v3889_v2 = vld [vmem:[%s4916_s1 + $0x488] sm:$0xff]   ;;  %v662_v3 = vcombine.high %v654_v63, %v654_v63  ;;  %v4559_v4 = vrot.slane %v647_v0, %v4161_v41  ;;  %v3891_v6 = vld [vmem:[%s4916_s1 + $0x4c0] sm:$0xff]  }
  0x67   :  { %3503 = vmatprep.subr.bf16.mxu1 %v3834_v5  ;;  %v3890_v5 = vld [vmem:[%s4916_s1 + $0x440] sm:$0xff]  }
  0x68   :  { %3482 = vmatpush3.bf16.msra.mxu0 %v3835_v7  ;;  %v684_v7 = vrot.slane %v662_v3, %v4161_v41  ;;  %v3940_v0 = vld [vmem:[%s4916_s1 + $0x6e0] sm:$0xff]   ;;  %v3943_v3 = vld [vmem:[%s4916_s1 + $0x658] sm:$0xff]  }
  0x69   :  { %3483 = vmatprep.subr.bf16.mxu0 %v3837_v9  ;;  %v3892_v9 = vld [vmem:[%s4916_s1 + $0x400] sm:$0xff]  }
  0x6a   :  { %3504 = vmatpush3.bf16.msra.mxu1 %v3836_v8  ;;  %v663_v8 = vcombine.high %v4559_v4, %v4559_v4 }
  0x6b   :  { %3505 = vmatprep.subr.bf16.mxu1 %v3838_v10  ;;  %v3893_v10 = vld [vmem:[%s4916_s1 + $0x480] sm:$0xff]  }
  0x6c   :  { %3484 = vmatpush3.bf16.msra.mxu0 %v3839_v11  ;;  %v694_v11 = vcombine.high %v684_v7, %v684_v7 }
  0x6d   :  { %3485 = vmatprep.subr.bf16.mxu0 %v3841_v13  ;;  %v3894_v13 = vld [vmem:[%s4916_s1 + $0x578] sm:$0xff]  }
  0x6e   :  { %3506 = vmatpush3.bf16.msra.mxu1 %v3840_v12  ;;  %v670_v12 = vrot.slane %v654_v63, %v4161_v41  ;;  %v3939_v63 = vld [vmem:[%s4916_s1 + $0x660] sm:$0xff]  }
  0x6f   :  { %3507 = vmatprep.subr.bf16.mxu1 %v3842_v14  ;;  %v3895_v14 = vld [vmem:[%s4916_s1 + $0x5f8] sm:$0xff]  }
  0x70   :  { %3486 = vmatpush3.bf16.msra.mxu0 %v3843_v15  ;;  %v691_v15 = vrot.slane %v663_v8, %v4161_v41  ;;  %v3948_v8 = vld [vmem:[%s4916_s1 + $0x6d0] sm:$0xff]  }
  0x71   :  { %3487 = vmatprep.subr.bf16.mxu0 %v3845_v17  ;;  %v3897_v17 = vld [vmem:[%s4916_s1 + $0x5b8] sm:$0xff]  }
  0x72   :  { %3508 = vmatpush3.bf16.msra.mxu1 %v3844_v16  ;;  %v3896_v16 = vld [vmem:[%s4916_s1 + $0x538] sm:$0xff]  }
  0x73   :  { %3509 = vmatprep.subr.bf16.mxu1 %v3846_v18  ;;  %v692_v18 = vcombine.high %v670_v12, %v670_v12 }
  0x74   :  { %3488 = vmatpush3.bf16.msra.mxu0 %v3847_v19  ;;  %v3898_v19 = vld [vmem:[%s4916_s1 + $0x570] sm:$0xff]  }
  0x75   :  { %3489 = vmatprep.subr.bf16.mxu0 %v3849_v21  ;;  %v695_v21 = vcombine.high %v691_v15, %v691_v15 }
  0x76   :  { %3510 = vmatpush3.bf16.msra.mxu1 %v3848_v20  ;;  %v3899_v20 = vld [vmem:[%s4916_s1 + $0x5f0] sm:$0xff]  }
  0x77   :  { %3511 = vmatprep.subr.bf16.mxu1 %v3850_v22  ;;  %v3900_v22 = vld [vmem:[%s4916_s1 + $0x530] sm:$0xff]  }
  0x78   :  { %3490 = vmatpush3.bf16.msra.mxu0 %v3851_v23  ;;  %v3901_v23 = vld [vmem:[%s4916_s1 + $0x5b0] sm:$0xff]  }
  0x79   :  { %3491 = vmatprep.subr.bf16.mxu0 %v3853_v25  ;;  %v3903_v25 = vld [vmem:[%s4916_s1 + $0x5e8] sm:$0xff]  }
  0x7a   :  { %3512 = vmatpush3.bf16.msra.mxu1 %v3852_v24  ;;  %v3902_v24 = vld [vmem:[%s4916_s1 + $0x568] sm:$0xff]  }
  0x7b   :  { %3513 = vmatprep.subr.bf16.mxu1 %v3854_v26  ;;  %v3904_v26 = vld [vmem:[%s4916_s1 + $0x528] sm:$0xff]  }
  0x7c   :  { %3492 = vmatpush3.bf16.msra.mxu0 %v3855_v27  ;;  %v3905_v27 = vld [vmem:[%s4916_s1 + $0x5a8] sm:$0xff]  }
  0x7d   :  { %3493 = vmatprep.subr.bf16.mxu0 %v3857_v29  ;;  %v3907_v29 = vld [vmem:[%s4916_s1 + $0x5e0] sm:$0xff]  }
  0x7e   :  { %3514 = vmatpush3.bf16.msra.mxu1 %v3856_v28  ;;  %v3906_v28 = vld [vmem:[%s4916_s1 + $0x560] sm:$0xff]  }
  0x7f   :  { %3515 = vmatprep.subr.bf16.mxu1 %v3858_v30  ;;  %v3908_v30 = vld [vmem:[%s4916_s1 + $0x520] sm:$0xff]  }
  0x80   :  { %3494 = vmatpush3.bf16.msra.mxu0 %v3859_v31  ;;  %v3909_v31 = vld [vmem:[%s4916_s1 + $0x5a0] sm:$0xff]  }
  0x81   :  { %3523 = vmatprep.subr.bf16.mxu0 %v3862_v34  ;;  %v3912_v34 = vld [vmem:[%s4916_s1 + $0x518] sm:$0xff]  }
  0x82   :  { %3516 = vmatpush3.bf16.msra.mxu1 %v3860_v32  ;;  %v3910_v32 = vld [vmem:[%s4916_s1 + $0x558] sm:$0xff]  }
  0x83   :  { %2586 = vmatmul.mubr.bf16.vlgmr.msra.gmra.mxu0 %v628_v33  ;;  %3545 = vmatprep.subr.bf16.mxu1 %v3863_v35  ;;  %v3911_v33 = vld [vmem:[%s4916_s1 + $0x5d8] sm:$0xff]  }
  0x84   :  { %3524 = vmatpush3.bf16.msra.mxu0 %v3864_v36  ;;  %2665 = vmatprep.mubr.bf16.mxu0 %v684_v7  ;;  %v3913_v35 = vld [vmem:[%s4916_s1 + $0x598] sm:$0xff]   ;;  %v3914_v36 = vld [vmem:[%s4916_s1 + $0x550] sm:$0xff]  }
  0x85   :  { %2626 = vmatmul.mubr.bf16.vlgmr.msra.gmra.mxu1 %v644_v38  ;;  %3525 = vmatprep.subr.bf16.mxu0 %v3866_v39  ;;  %v3916_v38 = vld [vmem:[%s4916_s1 + $0x510] sm:$0xff]  }
  0x86   :  { %3546 = vmatpush3.bf16.msra.mxu1 %v3865_v37  ;;  %2705 = vmatprep.mubr.bf16.mxu1 %v694_v11  ;;  %v3915_v37 = vld [vmem:[%s4916_s1 + $0x5d0] sm:$0xff]   ;;  %v3951_v11 = vld [vmem:[%s4916_s1 + $0x648] sm:$0xff]  }
  0x87   :  { %3547 = vmatprep.subr.bf16.mxu1 %v3867_v40  ;;  %v3917_v39 = vld [vmem:[%s4916_s1 + $0x590] sm:$0xff]   ;;  %v3918_v40 = vld [vmem:[%s4916_s1 + $0x548] sm:$0xff]  }
  0x88   :  { %3526 = vmatpush3.bf16.msra.mxu0 %v3868_v42  ;;  %v3919_v42 = vld [vmem:[%s4916_s1 + $0x5c8] sm:$0xff]   ;;  %v3947_v7 = vld [vmem:[%s4916_s1 + $0x650] sm:$0xff]  }
  0x89   :  { %3527 = vmatprep.subr.bf16.mxu0 %v3870_v44  ;;  %v3921_v44 = vld [vmem:[%s4916_s1 + $0x588] sm:$0xff]  }
  0x8a   :  { %3548 = vmatpush3.bf16.msra.mxu1 %v3869_v43  ;;  %v3920_v43 = vld [vmem:[%s4916_s1 + $0x508] sm:$0xff]  }
  0x8b   :  { %3549 = vmatprep.subr.bf16.mxu1 %v3871_v45  ;;  %v3922_v45 = vld [vmem:[%s4916_s1 + $0x540] sm:$0xff]  }
  0x8c   :  { %3528 = vmatpush3.bf16.msra.mxu0 %v3872_v46  ;;  %v3923_v46 = vld [vmem:[%s4916_s1 + $0x5c0] sm:$0xff]  }
  0x8d   :  { %3529 = vmatprep.subr.bf16.mxu0 %v3874_v48  ;;  %v3925_v48 = vld [vmem:[%s4916_s1 + $0x580] sm:$0xff]  }
  0x8e   :  { %3550 = vmatpush3.bf16.msra.mxu1 %v3873_v47  ;;  %v3924_v47 = vld [vmem:[%s4916_s1 + $0x500] sm:$0xff]  }
  0x8f   :  { %3551 = vmatprep.subr.bf16.mxu1 %v3875_v49  ;;  %v677_v49 = vrot.slane %v4559_v4, %v4161_v41  ;;  %v3944_v4 = vld [vmem:[%s4916_s1 + $0x6d8] sm:$0xff]  }
  0x90   :  { %3530 = vmatpush3.bf16.msra.mxu0 %v3876_v50  ;;  %v3927_v50 = vld [vmem:[%s4916_s1 + $0x678] sm:$0xff]  }
  0x91   :  { %3531 = vmatprep.subr.bf16.mxu0 %v3878_v52  ;;  %v3929_v52 = vld [vmem:[%s4916_s1 + $0x638] sm:$0xff]  }
  0x92   :  { %3552 = vmatpush3.bf16.msra.mxu1 %v3877_v51  ;;  %v3928_v51 = vld [vmem:[%s4916_s1 + $0x6f8] sm:$0xff]  }
  0x93   :  { %3553 = vmatprep.subr.bf16.mxu1 %v3879_v53  ;;  %v3930_v53 = vld [vmem:[%s4916_s1 + $0x6b8] sm:$0xff]  }
  0x94   :  { %3532 = vmatpush3.bf16.msra.mxu0 %v3880_v54  ;;  %v693_v54 = vcombine.high %v677_v49, %v677_v49 }
  0x95   :  { %3533 = vmatprep.subr.bf16.mxu0 %v3882_v56  ;;  %v3932_v56 = vld [vmem:[%s4916_s1 + $0x6f0] sm:$0xff]  }
  0x96   :  { %3554 = vmatpush3.bf16.msra.mxu1 %v3881_v55  ;;  %v3931_v55 = vld [vmem:[%s4916_s1 + $0x670] sm:$0xff]  }
  0x97   :  { %3555 = vmatprep.subr.bf16.mxu1 %v3883_v57  ;;  %v3933_v57 = vld [vmem:[%s4916_s1 + $0x630] sm:$0xff]  }
  0x98   :  { %3534 = vmatpush3.bf16.msra.mxu0 %v3884_v58  ;;  %v3934_v58 = vld [vmem:[%s4916_s1 + $0x6b0] sm:$0xff]  }
  0x99   :  { %3535 = vmatprep.subr.bf16.mxu0 %v3886_v60  ;;  %v3936_v60 = vld [vmem:[%s4916_s1 + $0x6e8] sm:$0xff]  }
  0x9a   :  { %3556 = vmatpush3.bf16.msra.mxu1 %v3885_v59  ;;  %v3935_v59 = vld [vmem:[%s4916_s1 + $0x668] sm:$0xff]  }
  0x9b   :  { %3557 = vmatprep.subr.bf16.mxu1 %v3887_v62  ;;  %v3938_v62 = vld [vmem:[%s4916_s1 + $0x6a8] sm:$0xff]  }
  0x9c   :  { %3536 = vmatpush3.bf16.msra.mxu0 %v3888_v1  ;;  %v3941_v1 = vld [vmem:[%s4916_s1 + $0x620] sm:$0xff]  }
  0x9d   :  { %3537 = vmatprep.subr.bf16.mxu0 %v3890_v5  ;;  %v3945_v5 = vld [vmem:[%s4916_s1 + $0x618] sm:$0xff]  }
  0x9e   :  { %3558 = vmatpush3.bf16.msra.mxu1 %v3889_v2  ;;  %v3942_v2 = vld [vmem:[%s4916_s1 + $0x6a0] sm:$0xff]  }
  0x9f   :  { %3559 = vmatprep.subr.bf16.mxu1 %v3891_v6  ;;  %v3946_v6 = vld [vmem:[%s4916_s1 + $0x698] sm:$0xff]  }
  0xa0   :  { %3538 = vmatpush3.bf16.msra.mxu0 %v3892_v9  ;;  %v3949_v9 = vld [vmem:[%s4916_s1 + $0x610] sm:$0xff]  }
  0xa1   :  { %3567 = vmatprep.subr.bf16.mxu0 %v3894_v13  ;;  %v3952_v13 = vld [vmem:[%s4916_s1 + $0x6c8] sm:$0xff]  }
  0xa2   :  { %3560 = vmatpush3.bf16.msra.mxu1 %v3893_v10  ;;  %v3950_v10 = vld [vmem:[%s4916_s1 + $0x690] sm:$0xff]  }
  0xa3   :  { %2666 = vmatmul.mubr.bf16.vlgmr.msra.gmra.mxu0 %v670_v12  ;;  %3589 = vmatprep.subr.bf16.mxu1 %v3895_v14  ;;  %v25_v12 = vld [vmem:[%s4915_s0 + $0x18] sm:$0xff] }
  0xa4   :  { %3568 = vmatpush3.bf16.msra.mxu0 %v3896_v16  ;;  %2745 = vmatprep.mubr.bf16.mxu0 %v691_v15  ;;  %v703_v14 = vrot.slane %v25_v12, %v4161_v41  ;;  %v696_v15 = vcombine.high %v25_v12, %v25_v12  ;;  %v3953_v16 = vld [vmem:[%s4916_s1 + $0x608] sm:$0xff]  }
  0xa5   :  { %2706 = vmatmul.mubr.bf16.vlgmr.msra.gmra.mxu1 %v692_v18  ;;  %3569 = vmatprep.subr.bf16.mxu0 %v3898_v19 }
  0xa6   :  { %3590 = vmatpush3.bf16.msra.mxu1 %v3897_v17  ;;  %2785 = vmatprep.mubr.bf16.mxu1 %v695_v21  ;;  %v3955_v17 = vld [vmem:[%s4916_s1 + $0x640] sm:$0xff]   ;;  %v711_v18 = vcombine.high %v703_v14, %v703_v14  ;;  %v4765_v19 = vrot.slane %v696_v15, %v4161_v41 }
  0xa7   :  { %3591 = vmatprep.subr.bf16.mxu1 %v3899_v20  ;;  %v3954_v20 = vld [vmem:[%s4916_s1 + $0x688] sm:$0xff]   ;;  %v3956_v21 = vld [vmem:[%s4916_s1 + $0x6c0] sm:$0xff]  }
  0xa8   :  { %3570 = vmatpush3.bf16.msra.mxu0 %v3900_v22  ;;  %v3957_v22 = vld [vmem:[%s4916_s1 + $0x600] sm:$0xff]  }
  0xa9   :  { %3571 = vmatprep.subr.bf16.mxu0 %v3902_v24  ;;  %v712_v24 = vcombine.high %v4765_v19, %v4765_v19 }
  0xaa   :  { %3592 = vmatpush3.bf16.msra.mxu1 %v3901_v23  ;;  %v733_v23 = vrot.slane %v711_v18, %v4161_v41 }
  0xab   :  { %3593 = vmatprep.subr.bf16.mxu1 %v3903_v25  ;;  %v3958_v25 = vld [vmem:[%s4916_s1 + $0x680] sm:$0xff]  }
  0xac   :  { %3572 = vmatpush3.bf16.msra.mxu0 %v3904_v26  ;;  %v743_v26 = vcombine.high %v733_v23, %v733_v23 }
  0xad   :  { %3573 = vmatprep.subr.bf16.mxu0 %v3906_v28  ;;  %v3959_v28 = vld [vmem:[%s4916_s1 + $0x778] sm:$0xff]  }
  0xae   :  { %3594 = vmatpush3.bf16.msra.mxu1 %v3905_v27  ;;  %v719_v27 = vrot.slane %v703_v14, %v4161_v41 }
  0xaf   :  { %3595 = vmatprep.subr.bf16.mxu1 %v3907_v29  ;;  %v3960_v29 = vld [vmem:[%s4916_s1 + $0x7f8] sm:$0xff]  }
  0xb0   :  { %3574 = vmatpush3.bf16.msra.mxu0 %v3908_v30  ;;  %v740_v30 = vrot.slane %v712_v24, %v4161_v41 }
  0xb1   :  { %3575 = vmatprep.subr.bf16.mxu0 %v3910_v32  ;;  %v3962_v32 = vld [vmem:[%s4916_s1 + $0x7b8] sm:$0xff]  }
  0xb2   :  { %3596 = vmatpush3.bf16.msra.mxu1 %v3909_v31  ;;  %v3961_v31 = vld [vmem:[%s4916_s1 + $0x738] sm:$0xff]  }
  0xb3   :  { %3597 = vmatprep.subr.bf16.mxu1 %v3911_v33  ;;  %v741_v33 = vcombine.high %v719_v27, %v719_v27 }
  0xb4   :  { %3576 = vmatpush3.bf16.msra.mxu0 %v3912_v34  ;;  %v3963_v34 = vld [vmem:[%s4916_s1 + $0x770] sm:$0xff]  }
  0xb5   :  { %3577 = vmatprep.subr.bf16.mxu0 %v3914_v36  ;;  %v744_v36 = vcombine.high %v740_v30, %v740_v30 }
  0xb6   :  { %3598 = vmatpush3.bf16.msra.mxu1 %v3913_v35  ;;  %v3964_v35 = vld [vmem:[%s4916_s1 + $0x7f0] sm:$0xff]  }
  0xb7   :  { %3599 = vmatprep.subr.bf16.mxu1 %v3915_v37 }
  0xb8   :  { %3578 = vmatpush3.bf16.msra.mxu0 %v3916_v38  ;;  %v3081_v38 = vld [vmem:[%s4917_s2] ss:$0 sm:$0xff] }
  0xb9   :  { %3579 = vmatprep.subr.bf16.mxu0 %v3918_v40  ;;  %v3966_v40 = vld [vmem:[%s4916_s1 + $0x7b0] sm:$0xff]  }
  0xba   :  { %3600 = vmatpush3.bf16.msra.mxu1 %v3917_v39  ;;  %v3965_v39 = vld [vmem:[%s4916_s1 + $0x730] sm:$0xff]  }
  0xbb   :  { %3601 = vmatprep.subr.bf16.mxu1 %v3919_v42 }
  0xbc   :  { %3580 = vmatpush3.bf16.msra.mxu0 %v3920_v43 }
  0xbd   :  { %3581 = vmatprep.subr.bf16.mxu0 %v3922_v45 }
  0xbe   :  { %3602 = vmatpush3.bf16.msra.mxu1 %v3921_v44  ;;  %v3967_v44 = vld [vmem:[%s4916_s1 + $0x768] sm:$0xff]  }
  0xbf   :  { %3603 = vmatprep.subr.bf16.mxu1 %v3923_v46  ;;  %v3968_v46 = vld [vmem:[%s4916_s1 + $0x7e8] sm:$0xff]  }
  0xc0   :  { %3582 = vmatpush3.bf16.msra.mxu0 %v3924_v47 }
  0xc1   :  { %3611 = vmatprep.subr.bf16.mxu0 %v3927_v50 }
  0xc2   :  { %3604 = vmatpush3.bf16.msra.mxu1 %v3925_v48 }
  0xc3   :  { %2746 = vmatmul.mubr.bf16.vlgmr.msra.gmra.mxu0 %v677_v49  ;;  %3633 = vmatprep.subr.bf16.mxu1 %v3928_v51  ;;  %v3969_v49 = vld [vmem:[%s4916_s1 + $0x728] sm:$0xff]  }
  0xc4   :  { %3612 = vmatpush3.bf16.msra.mxu0 %v3929_v52  ;;  %2825 = vmatprep.mubr.bf16.mxu0 %v733_v23  ;;  %v3970_v52 = vld [vmem:[%s4916_s1 + $0x7a8] sm:$0xff]  }
  0xc5   :  { %2786 = vmatmul.mubr.bf16.vlgmr.msra.gmra.mxu1 %v693_v54  ;;  %3613 = vmatprep.subr.bf16.mxu0 %v3931_v55  ;;  %v3971_v55 = vld [vmem:[%s4916_s1 + $0x760] sm:$0xff]  }
  0xc6   :  { %3634 = vmatpush3.bf16.msra.mxu1 %v3930_v53  ;;  %2865 = vmatprep.mubr.bf16.mxu1 %v743_v26 }
  0xc7   :  { %3635 = vmatprep.subr.bf16.mxu1 %v3932_v56 }
  0xc8   :  { %3614 = vmatpush3.bf16.msra.mxu0 %v3933_v57  ;;  %v3972_v57 = vld [vmem:[%s4916_s1 + $0x7e0] sm:$0xff]  }
  0xc9   :  { %3615 = vmatprep.subr.bf16.mxu0 %v3935_v59  ;;  %v3973_v59 = vld [vmem:[%s4916_s1 + $0x720] sm:$0xff]  }
  0xca   :  { %3636 = vmatpush3.bf16.msra.mxu1 %v3934_v58 }
  0xcb   :  { %3637 = vmatprep.subr.bf16.mxu1 %v3936_v60  ;;  %v3974_v60 = vld [vmem:[%s4916_s1 + $0x7a0] sm:$0xff]  }
  0xcc   :  { %3616 = vmatpush3.bf16.msra.mxu0 %v3937_v61  ;;  %v3975_v61 = vld [vmem:[%s4916_s1 + $0x758] sm:$0xff]  }
  0xcd   :  { %3617 = vmatprep.subr.bf16.mxu0 %v3939_v63  ;;  %v3977_v63 = vld [vmem:[%s4916_s1 + $0x718] sm:$0xff]  }
  0xce   :  { %3638 = vmatpush3.bf16.msra.mxu1 %v3938_v62  ;;  %v3976_v62 = vld [vmem:[%s4916_s1 + $0x7d8] sm:$0xff]  }
  0xcf   :  { %3639 = vmatprep.subr.bf16.mxu1 %v3940_v0  ;;  %v3978_v0 = vld [vmem:[%s4916_s1 + $0x798] sm:$0xff]  }
  0xd0   :  { %3618 = vmatpush3.bf16.msra.mxu0 %v3941_v1  ;;  %v3979_v1 = vld [vmem:[%s4916_s1 + $0x750] sm:$0xff]  }
  0xd1   :  { %3619 = vmatprep.subr.bf16.mxu0 %v3943_v3  ;;  %v3981_v3 = vld [vmem:[%s4916_s1 + $0x710] sm:$0xff]  }
  0xd2   :  { %3640 = vmatpush3.bf16.msra.mxu1 %v3942_v2  ;;  %v3980_v2 = vld [vmem:[%s4916_s1 + $0x7d0] sm:$0xff]  }
  0xd3   :  { %3641 = vmatprep.subr.bf16.mxu1 %v3944_v4  ;;  %v3982_v4 = vld [vmem:[%s4916_s1 + $0x790] sm:$0xff]  }
  0xd4   :  { %3620 = vmatpush3.bf16.msra.mxu0 %v3945_v5  ;;  %v3983_v5 = vld [vmem:[%s4916_s1 + $0x748] sm:$0xff]  }
  0xd5   :  { %3621 = vmatprep.subr.bf16.mxu0 %v3947_v7  ;;  %v3985_v7 = vld [vmem:[%s4916_s1 + $0x708] sm:$0xff]  }
  0xd6   :  { %3642 = vmatpush3.bf16.msra.mxu1 %v3946_v6  ;;  %v3984_v6 = vld [vmem:[%s4916_s1 + $0x7c8] sm:$0xff]  }
  0xd7   :  { %3643 = vmatprep.subr.bf16.mxu1 %v3948_v8  ;;  %v3987_v8 = vld [vmem:[%s4916_s1 + $0x740] sm:$0xff]  }
  0xd8   :  { %3622 = vmatpush3.bf16.msra.mxu0 %v3949_v9  ;;  %v3986_v9 = vld [vmem:[%s4916_s1 + $0x788] sm:$0xff]  }
  0xd9   :  { %3623 = vmatprep.subr.bf16.mxu0 %v3951_v11  ;;  %v3989_v11 = vld [vmem:[%s4916_s1 + $0x700] sm:$0xff]  }
  0xda   :  { %3644 = vmatpush3.bf16.msra.mxu1 %v3950_v10  ;;  %v3988_v10 = vld [vmem:[%s4916_s1 + $0x7c0] sm:$0xff]  }
  0xdb   :  { %3645 = vmatprep.subr.bf16.mxu1 %v3952_v13 }
  0xdc   :  { %3624 = vmatpush3.bf16.msra.mxu0 %v3953_v16 }
  0xdd   :  { %3625 = vmatprep.subr.bf16.mxu0 %v3955_v17 }
  0xde   :  { %3646 = vmatpush3.bf16.msra.mxu1 %v3954_v20 }
  0xdf   :  { %3647 = vmatprep.subr.bf16.mxu1 %v3956_v21 }
  0xe0   :  { %3626 = vmatpush3.bf16.msra.mxu0 %v3957_v22 }
  0xe1   :  { %3655 = vmatprep.subr.bf16.mxu0 %v3959_v28 }
  0xe2   :  { %3648 = vmatpush3.bf16.msra.mxu1 %v3958_v25 }
  0xe3   :  { %v3363_v37 = vpop.f32.mrf.mxu0  ;;  %2826 = vmatmul.mubr.bf16.vlgmr.msra.gmra.mxu0 %v719_v27  ;;  %3677 = vmatprep.subr.bf16.mxu1 %v3960_v29 }
  0xe4   :  { %3656 = vmatpush3.bf16.msra.mxu0 %v3961_v31  ;;  %2905 = vmatprep.mubr.bf16.mxu0 %v740_v30  ;;  %v3385_v42 = vpop.f32.mrf.mxu1 }
  0xe5   :  { %2866 = vmatmul.mubr.bf16.vlgmr.msra.gmra.mxu1 %v741_v33  ;;  %v3364_v43 = vpop.f32.mrf.mxu0  ;;  %3657 = vmatprep.subr.bf16.mxu0 %v3963_v34 }
  0xe6   :  { %3678 = vmatpush3.bf16.msra.mxu1 %v3962_v32  ;;  %v3365_v45 = vadd.f32 %v3364_v43, %v3363_v37  ;;  %2945 = vmatprep.mubr.bf16.mxu1 %v744_v36  ;;  %v3386_v47 = vpop.f32.mrf.mxu1 }
  0xe7   :  { %v3366_v48 = vpop.f32.mrf.mxu0  ;;  %3679 = vmatprep.subr.bf16.mxu1 %v3964_v35  ;;  %v3387_v51 = vadd.f32 %v3386_v47, %v3385_v42 }
  0xe8   :  { %v2348_v50 = vadd.f32 %v3365_v45, %v3081_v38  ;;  %3658 = vmatpush3.bf16.msra.mxu0 %v3965_v39  ;;  %v3388_v53 = vpop.f32.mrf.mxu1 }
  0xe9   :  { %v3367_v54 = vpop.f32.mrf.mxu0  ;;  %3659 = vmatprep.subr.bf16.mxu0 %v3967_v44 }
  0xea   :  { %v2388_v56 = vadd.f32 %v3387_v51, %v2348_v50  ;;  %3680 = vmatpush3.bf16.msra.mxu1 %v3966_v40  ;;  %v3389_v58 = vpop.f32.mrf.mxu1 }
  0xeb   :  { %3681 = vmatprep.subr.bf16.mxu1 %v3968_v46 }
  0xec   :  { %3660 = vmatpush3.bf16.msra.mxu0 %v3969_v49 }
  0xed   :  { %3661 = vmatprep.subr.bf16.mxu0 %v3971_v55 }
  0xee   :  { %3682 = vmatpush3.bf16.msra.mxu1 %v3970_v52 }
  0xef   :  { %3683 = vmatprep.subr.bf16.mxu1 %v3972_v57 }
  0xf0   :  { %3662 = vmatpush3.bf16.msra.mxu0 %v3973_v59 }
  0xf1   :  { %3663 = vmatprep.subr.bf16.mxu0 %v3975_v61 }
  0xf2   :  { %3684 = vmatpush3.bf16.msra.mxu1 %v3974_v60 }
  0xf3   :  { %3685 = vmatprep.subr.bf16.mxu1 %v3976_v62 }
  0xf4   :  { %3664 = vmatpush3.bf16.msra.mxu0 %v3977_v63 }
  0xf5   :  { %3665 = vmatprep.subr.bf16.mxu0 %v3979_v1 }
  0xf6   :  { %3686 = vmatpush3.bf16.msra.mxu1 %v3978_v0 }
  0xf7   :  { %3687 = vmatprep.subr.bf16.mxu1 %v3980_v2 }
  0xf8   :  { %3666 = vmatpush3.bf16.msra.mxu0 %v3981_v3 }
  0xf9   :  { %3667 = vmatprep.subr.bf16.mxu0 %v3983_v5 }
  0xfa   :  { %3688 = vmatpush3.bf16.msra.mxu1 %v3982_v4 }
  0xfb   :  { %3689 = vmatprep.subr.bf16.mxu1 %v3984_v6 }
  0xfc   :  { %3668 = vmatpush3.bf16.msra.mxu0 %v3985_v7 }
  0xfd   :  { %10 = vsyncpa [#allocation3], 0  ;;  %3669 = vmatprep.subr.bf16.mxu0 %v3987_v8  ;;  %v726_v12 = vrot.slane %v4765_v19, %v4161_v41  ;;  %v3990_v13 = vld [vmem:[%s4916_s1 + $0x780] sm:$0xff]   ;;  %v3992_v38 = vld [vmem:[%s4918_s3 + $0x38] sm:$0xff]   ;;  %v4023_v39 = vmov 0.0   ;;  %vm4024_vm0 = vmmov 0  }
  0xfe   :  { %3690 = vmatpush3.bf16.msra.mxu1 %v3986_v9  ;;  %v3993_v40 = vld [vmem:[%s4918_s3 + $0x30] sm:$0xff]   ;;  %v3994_v42 = vld [vmem:[%s4918_s3 + $0x28] sm:$0xff]   ;;  %v3995_v43 = vld [vmem:[%s4918_s3 + $0x20] sm:$0xff]   ;;  %s4025_s24 = smov [#allocation2]  }
  0xff   :  { %3691 = vmatprep.subr.bf16.mxu1 %v3988_v10  ;;  %v742_v14 = vcombine.high %v726_v12, %v726_v12  ;;  %v3996_v44 = vld [vmem:[%s4918_s3 + $0x18] sm:$0xff]   ;;  %v3997_v48 = vld [vmem:[%s4918_s3 + $0x10] sm:$0xff]   ;;  %v3999_v59 = vld [vmem:[%s4918_s3] sm:$0xff]   ;;  %s3073_s25 = sshll.u32 %s4025_s24, 4  ;;  %s3074_s25 = int_to_ptr.vmem [resolvable:$true] %s3073_s25 }
 0x100   :  { %3670 = vmatpush3.bf16.msra.mxu0 %v3989_v11  ;;  %s4000_s26 = scalar_lea.vmem %s3074_s25, 32  ;;  %p4005_p1 = scmp.lt.s32.totalorder %s3074_s25, %s3074_s25 }
 0x101   :  { %3708 = vmatprep.subr.bf16.mxu0 %v4023_v39  ;;  %p4001_p0 = scmp.ne.s32.totalorder %s3074_s25, %s4000_s26  ;;  %p4006_p2 = scmp.lt.s32.totalorder %s4000_s26, %s4000_s26 }
 0x102   :  { %3692 = vmatpush3.bf16.msra.mxu1 %v3990_v13 }
 0x103   :  { %v3407_v15 = vpop.f32.mrf.mxu0  ;;  %2906 = vmatmul.mubr.bf16.vlgmr.msra.gmra.mxu0 %v726_v12  ;;  %p4007_p3 = por %p4006_p2, %p4005_p1 }
 0x104   :  { %v3429_v16 = vpop.f32.mrf.mxu1  ;;  %3709 = vmatpush3.bf16.msra.mxu0 %v3992_v38  ;;  %3724 = vmatprep.mubr.msk.bf16.mxu0 %vm4024_vm0, %v4023_v39 }
 0x105   :  { %2946 = vmatmul.mubr.bf16.vlgmr.msra.gmra.mxu1 %v742_v14  ;;  %v3408_v17 = vpop.f32.mrf.mxu0  ;;  %3710 = vmatprep.subr.bf16.mxu0 %v4023_v39  ;;  %p4008_p4 = pnand %p4007_p3, %p4001_p0 }
 0x106   :  { %v3409_v18 = vadd.f32 %v3408_v17, %v3407_v15  ;;  %v3430_v20 = vpop.f32.mrf.mxu1 }
 0x107   :  { %v3410_v21 = vpop.f32.mrf.mxu0  ;;  %v3431_v23 = vadd.f32 %v3430_v20, %v3429_v16 }
 0x108   :  { %v2428_v22 = vadd.f32 %v3409_v18, %v2388_v56  ;;  %v3432_v41 = vpop.f32.mrf.mxu1  ;;  %3711 = vmatpush3.bf16.msra.mxu0 %v3993_v40  ;;  %v3998_v56 = vld [vmem:[%s4918_s3 + $0x8] sm:$0xff]  }
 0x109   :  { %v3411_v19 = vpop.f32.mrf.mxu0  ;;  %3712 = vmatprep.subr.bf16.mxu0 %v4023_v39 }
 0x10a   :  { %v2468_v24 = vadd.f32 %v3431_v23, %v2428_v22  ;;  %v3433_v25 = vpop.f32.mrf.mxu1 }
 0x10c   :  { %3713 = vmatpush3.bf16.msra.mxu0 %v3994_v42 }
 0x10d   :  { %3714 = vmatprep.subr.bf16.mxu0 %v4023_v39 }
 0x110   :  { %3715 = vmatpush3.bf16.msra.mxu0 %v3995_v43 }
 0x111   :  { %3716 = vmatprep.subr.bf16.mxu0 %v4023_v39 }
 0x114   :  { %3717 = vmatpush3.bf16.msra.mxu0 %v3996_v44 }
 0x115   :  { %3718 = vmatprep.subr.bf16.mxu0 %v4023_v39 }
 0x118   :  { %3719 = vmatpush3.bf16.msra.mxu0 %v3997_v48 }
 0x119   :  { %3720 = vmatprep.subr.bf16.mxu0 %v4023_v39 }
 0x11c   :  { %3721 = vmatpush3.bf16.msra.mxu0 %v3998_v56 }
 0x11d   :  { %3722 = vmatprep.subr.bf16.mxu0 %v4023_v39 }
 0x120   :  { %3723 = vmatpush3.bf16.msra.mxu0 %v3999_v59 }
 0x123   :  { %v3451_v26 = vpop.f32.mrf.mxu0 }
 0x125   :  { %v3473_v27 = vpop.f32.mrf.mxu1  ;;  %v3452_v28 = vpop.f32.mrf.mxu0 }
 0x126   :  { %v3453_v29 = vadd.f32 %v3452_v28, %v3451_v26 }
 0x127   :  { %v3474_v30 = vpop.f32.mrf.mxu1  ;;  %v3454_v31 = vpop.f32.mrf.mxu0 }
 0x128   :  { %v2508_v32 = vadd.f32 %v3453_v29, %v2468_v24  ;;  %v3475_v33 = vadd.f32 %v3474_v30, %v3473_v27 }
 0x129   :  { %v3476_v34 = vpop.f32.mrf.mxu1  ;;  %v3455_v35 = vpop.f32.mrf.mxu0 }
 0x12a   :  { %v2548_v36 = vadd.f32 %v3475_v33, %v2508_v32 }
 0x12b   :  { %v3477_v37 = vpop.f32.mrf.mxu1 }
 0x143   :  { %v3495_v45 = vpop.f32.mrf.mxu0 }
 0x145   :  { %v3517_v46 = vpop.f32.mrf.mxu1  ;;  %v3496_v47 = vpop.f32.mrf.mxu0 }
 0x146   :  { %v3497_v49 = vadd.f32 %v3496_v47, %v3495_v45 }
 0x147   :  { %v3518_v50 = vpop.f32.mrf.mxu1  ;;  %v3498_v51 = vpop.f32.mrf.mxu0 }
 0x148   :  { %v2588_v52 = vadd.f32 %v3497_v49, %v2548_v36  ;;  %v3519_v53 = vadd.f32 %v3518_v50, %v3517_v46  ;;  %v3338_v46 = vld [vmem:[%s4919_s4] ss:$0 sm:$0xff] }
 0x149   :  { %v3520_v54 = vpop.f32.mrf.mxu1  ;;  %v3499_v55 = vpop.f32.mrf.mxu0 }
 0x14a   :  { %v2628_v57 = vadd.f32 %v3519_v53, %v2588_v52 }
 0x14b   :  { %v3521_v58 = vpop.f32.mrf.mxu1 }
 0x163   :  { %v3539_v60 = vpop.f32.mrf.mxu0 }
 0x165   :  { %v3561_v61 = vpop.f32.mrf.mxu1  ;;  %v3540_v62 = vpop.f32.mrf.mxu0 }
 0x166   :  { %v3541_v63 = vadd.f32 %v3540_v62, %v3539_v60 }
 0x167   :  { %v3562_v0 = vpop.f32.mrf.mxu1  ;;  %v3542_v1 = vpop.f32.mrf.mxu0 }
 0x168   :  { %v2668_v2 = vadd.f32 %v3541_v63, %v2628_v57  ;;  %v3563_v3 = vadd.f32 %v3562_v0, %v3561_v61 }
 0x169   :  { %v3564_v4 = vpop.f32.mrf.mxu1  ;;  %v3543_v5 = vpop.f32.mrf.mxu0 }
 0x16a   :  { %v2708_v6 = vadd.f32 %v3563_v3, %v2668_v2 }
 0x16b   :  { %v3565_v7 = vpop.f32.mrf.mxu1 }
 0x183   :  { %v3583_v8 = vpop.f32.mrf.mxu0 }
 0x185   :  { %v3605_v9 = vpop.f32.mrf.mxu1  ;;  %v3584_v10 = vpop.f32.mrf.mxu0 }
 0x186   :  { %v3585_v19 = vadd.f32 %v3584_v10, %v3583_v8 }
 0x187   :  { %v3606_v11 = vpop.f32.mrf.mxu1  ;;  %v3586_v12 = vpop.f32.mrf.mxu0 }
 0x188   :  { %v2748_v24 = vadd.f32 %v3585_v19, %v2708_v6  ;;  %v3607_v25 = vadd.f32 %v3606_v11, %v3605_v9 }
 0x189   :  { %v3608_v13 = vpop.f32.mrf.mxu1  ;;  %v3587_v14 = vpop.f32.mrf.mxu0 }
 0x18a   :  { %v2788_v27 = vadd.f32 %v3607_v25, %v2748_v24 }
 0x18b   :  { %v3609_v15 = vpop.f32.mrf.mxu1 }
 0x1a3   :  { %v3627_v16 = vpop.f32.mrf.mxu0 }
 0x1a5   :  { %v3649_v17 = vpop.f32.mrf.mxu1  ;;  %v3628_v18 = vpop.f32.mrf.mxu0 }
 0x1a6   :  { %v3629_v26 = vadd.f32 %v3628_v18, %v3627_v16 }
 0x1a7   :  { %v3650_v20 = vpop.f32.mrf.mxu1  ;;  %v3630_v21 = vpop.f32.mrf.mxu0 }
 0x1a8   :  { %v2828_v28 = vadd.f32 %v3629_v26, %v2788_v27  ;;  %v3651_v29 = vadd.f32 %v3650_v20, %v3649_v17 }
 0x1a9   :  { %v3652_v22 = vpop.f32.mrf.mxu1  ;;  %v3631_v23 = vpop.f32.mrf.mxu0 }
 0x1aa   :  { %v2868_v33 = vadd.f32 %v3651_v29, %v2828_v28 }
 0x1ab   :  { %v3653_v41 = vpop.f32.mrf.mxu1 }
 0x1c3   :  { %v3671_v30 = vpop.f32.mrf.mxu0 }
 0x1c5   :  { %v3693_v31 = vpop.f32.mrf.mxu1  ;;  %v3672_v32 = vpop.f32.mrf.mxu0 }
 0x1c6   :  { %v3673_v34 = vadd.f32 %v3672_v32, %v3671_v30 }
 0x1c7   :  { %v3694_v35 = vpop.f32.mrf.mxu1  ;;  %v3674_v36 = vpop.f32.mrf.mxu0 }
 0x1c8   :  { %v2908_v37 = vadd.f32 %v3673_v34, %v2868_v33  ;;  %v3695_v38 = vadd.f32 %v3694_v35, %v3693_v31 }
 0x1c9   :  { %v3696_v39 = vpop.f32.mrf.mxu1  ;;  %v3675_v40 = vpop.f32.mrf.mxu0 }
 0x1ca   :  { %v2948_v42 = vadd.f32 %v3695_v38, %v2908_v37 }
 0x1cb   :  { %v3697_v43 = vpop.f32.mrf.mxu1 }
 0x1cc   :  { %v2953_v44 = vmax.f32 %v2948_v42, 0.0 }
 0x1ce   :  { %v2954_v45 = vpack.c.bf16 %v2953_v44, %v2953_v44 }
 0x1d0   :  { %3725 = vmatmul.mubr.bf16.vlgmr.msra.gmra.mxu0 %v2954_v45 }
 0x290   :  { %v3060_v47 = vpop.f32.mrf.mxu0 }
 0x291   :  { %v3061_v48 = vadd.f32 %v3338_v46, %v3060_v47 }
 0x292   :  { %v3726_v49 = vpop.f32.mrf.mxu0 }
 0x293   :  { %3066 = vst [vmem:[#allocation2] sm:$0x3] %v3061_v48 }
 0x294   :  { %v3063_v50 = vpop.f32.mrf.mxu0 }
 0x295   :  { %4011 = shalt.err (!%p4008_p4)
}
 0x296   :  { %3076 = dma.vmem_to_hbm [thread:$0]  %s3074_s25, 32, %s4920_s5, [#allocation3]   ;;  %v3727_v51 = vpop.f32.mrf.mxu0 }
 0x297   :  { %4020 = dma.done.wait [#allocation3], 32  }
 0x298   :  { %4021 = vsyncadd [#allocation3], 4294967264 }
 0x299   :  { %3080 = vsyncpa [#allocation3], 1 }

</bundles_post_ra>
